<compile_context>
chip_gen: v7x
topology: tpu7x:2x2x1
jax: 0.10.0
libtpu: 0.0.40
codegen_flags: <defaults>
</compile_context>

<pallas_src>
import functools
import math

import jax
import jax.numpy as jnp
from jax.experimental import pallas as pl
from jax.experimental.pallas import tpu as pltpu

LANES = 128


# --------------------------------------------------------------------------- #
# Host-side helpers
# --------------------------------------------------------------------------- #
def _round_up(x, m):
    return ((x + m - 1) // m) * m


def _choose_tile_rows(rows, channels, target_bytes=1 << 20):
    """Largest 8-aligned row tile whose block is <= ~target_bytes (~1 MiB).

    Worst-case VMEM: (1 in + 1 out) * double-buffer * block + ~4*C live
    in-body tiles ~= 8 x block bytes ~= 8 MiB, well under the 32 MiB limit we
    set (and under every generation's physical VMEM, incl. v7x's 64 MiB).
    """
    t = max(8, (target_bytes // (channels * LANES * 4)) // 8 * 8)
    return min(t, _round_up(rows, 8))


def _dpm2m_step_coeffs(sigma_last, sigma, sigma_next, have_old):
    """Return (c0, c1, c2, use_old): x_new = c0*x + c1*denoised + c2*old."""
    if sigma_next == 0.0:
        # t_next = +inf  =>  sigma_fn(t_next)/sigma_fn(t) = 0,  -expm1(-h) = 1
        return 0.0, 1.0, 0.0, False
    t = -math.log(sigma)
    t_next = -math.log(sigma_next)
    h = t_next - t
    c0 = min(sigma_next, sigma) / max(sigma_next, sigma)
    if not have_old:
        return c0, -math.expm1(-h), 0.0, False
    h_last = t - (-math.log(sigma_last))
    h_min, h_max = min(h_last, h), max(h_last, h)
    r = h_max / h_min
    h_d = 0.5 * (h_max + h_min)
    e = math.expm1(-h_d)
    return c0, -e * (1.0 + 1.0 / (2.0 * r)), e / (2.0 * r), True


# --------------------------------------------------------------------------- #
# Fused whole-loop kernel
# --------------------------------------------------------------------------- #
def _make_fused_kernel(C, num_steps, c0s, c1s, c2s, use_olds):
    """All sampler steps run on one resident (C, tile_rows, 128) row tile.

    Per step i (coefficients baked in as Python constants, W_eff[i] read as
    scalars from SMEM):
        d[co]  = sum_ci W_eff[i][ci, co] * x[ci]        (VPU broadcast FMAs)
        x[co]  = c0*x[co] + c1*d[co] (+ c2*old[co])
        old    = d
    Final: clip to [-1, 1] and store once.
    """

    def kernel(w_ref, x_ref, o_ref):
        xs = [x_ref[c] for c in range(C)]
        old = None
        for i in range(num_steps):
            base = i * C * C
            den = []
            for co in range(C):
                d = xs[0] * w_ref[base + co]
                for ci in range(1, C):
                    d = d + xs[ci] * w_ref[base + ci * C + co]
                den.append(d)
            new_xs = []
            for co in range(C):
                xn = c0s[i] * xs[co] + c1s[i] * den[co]
                if use_olds[i]:
                    xn = xn + c2s[i] * old[co]
                new_xs.append(xn)
            xs = new_xs
            old = den
        for co in range(C):
            o_ref[co] = jnp.clip(xs[co], -1.0, 1.0)

    return kernel


# --------------------------------------------------------------------------- #
# Cached, jitted sampler builder (keyed on shape / sigmas / flags)
# --------------------------------------------------------------------------- #
@functools.lru_cache(maxsize=None)
def _build_sampler_fn(shape, sigmas, num_steps, cond_scale, reflow):
    B, C, H, W = shape
    sig = list(sigmas)
    N = B * H * W
    rows = (N + LANES - 1) // LANES
    tile_rows = _choose_tile_rows(rows, C)
    padded_rows = _round_up(max(rows, 8), tile_rows)
    n_pad = padded_rows * LANES

    # Host-side scalar math for every step (baked into the kernel).
    c0s, c1s, c2s, use_olds = [], [], [], []
    for i in range(num_steps):
        c0, c1, c2, use_old = _dpm2m_step_coeffs(
            sig[i - 1], sig[i], sig[i + 1], have_old=(i > 0))
        if i == 0:
            c0 = c0 * sig[0]  # fold the `sigmas[0] * noise` prescale
        c0s.append(c0)
        c1s.append(c1)
        c2s.append(c2)
        use_olds.append(use_old)

    kernel = _make_fused_kernel(C, num_steps, tuple(c0s), tuple(c1s),
                                tuple(c2s), tuple(use_olds))

    grid = (padded_rows // tile_rows,)
    vspec = pl.BlockSpec((C, tile_rows, LANES), lambda i: (0, i, 0))
    w_spec = pl.BlockSpec((num_steps * C * C,), lambda i: (0,),
                          memory_space=pltpu.MemorySpace.SMEM)

    call = pl.pallas_call(
        kernel,
        grid=grid,
        out_shape=jax.ShapeDtypeStruct((C, padded_rows, LANES), jnp.float32),
        in_specs=[w_spec, vspec],
        out_specs=vspec,
        compiler_params=pltpu.CompilerParams(
            # TODO(synk): on v7x, pltpu.CORE_PARALLEL on the row axis would
            # split the grid across both TensorCores; "parallel" is kept here
            # for portability across v5e/v6e.
            dimension_semantics=("parallel",),
            vmem_limit_bytes=32 * 1024 * 1024),
    )

    def run(noise_nchw, weight):
        weight = weight.astype(jnp.float32)

        # Per-step effective mix matrices with every per-step scalar folded in.
        eye = jnp.eye(C, dtype=jnp.float32)
        mats = []
        for i in range(num_steps):
            scale = cond_scale / (1.0 + sig[i])
            m = scale * weight
            if reflow:
                m = eye - sig[i] * m
            if i == 0:
                m = sig[0] * m  # fold the `sigmas[0] * noise` prescale
            mats.append(m)
        w_eff = jnp.stack(mats).reshape(-1)

        # One layout conversion at entry: NCHW -> lane-dense (C, rows, 128).
        x = jnp.transpose(noise_nchw, (1, 0, 2, 3)).reshape(C, N)
        x = x.astype(jnp.float32)
        if n_pad != N:
            x = jnp.pad(x, ((0, 0), (0, n_pad - N)))
        x = x.reshape(C, padded_rows, LANES)

        x = call(w_eff, x)

        # One layout conversion at exit (clamp already fused into the kernel).
        x = x.reshape(C, n_pad)[:, :N].reshape(C, B, H, W)
        return jnp.transpose(x, (1, 0, 2, 3))

    return jax.jit(run)


# --------------------------------------------------------------------------- #
# Synthetic denoiser weights (the PyTorch module receives fn/net from outside)
# --------------------------------------------------------------------------- #
def make_net(channels):
    eye = jnp.eye(channels, dtype=jnp.float32)
    weight = 0.9 * eye + 0.02 * jnp.ones((channels, channels), dtype=jnp.float32)
    return {"weight": weight}


# --------------------------------------------------------------------------- #
# Sampler (mirrors the PyTorch module's forward semantics)
# --------------------------------------------------------------------------- #
class DPM2MSampler:
    """DPM-Solver++(2M) Karras, deterministic. One fused Pallas kernel total."""

    def __init__(self, num_steps=50, cond_scale=1.0, reflow=False):
        self.num_steps = num_steps
        self.cond_scale = cond_scale
        self.reflow = reflow

    def forward(self, noise, fn=None, net=None, sigmas=None, **kwargs):
        # TODO(synk): an arbitrary external `fn`/`net` denoiser callable cannot
        # be fused into the Pallas kernel; the fused kernel implements the
        # synthetic stand-in fn(x, sigma) = cond_scale/(1+sigma)*channel_mix(x, W).
        del fn, kwargs
        assert self.num_steps >= 1
        sig = tuple(float(s) for s in sigmas)
        assert len(sig) >= self.num_steps + 1
        weight = jnp.asarray(net["weight"], dtype=jnp.float32)
        run = _build_sampler_fn(tuple(int(d) for d in noise.shape), sig,
                                int(self.num_steps), float(self.cond_scale),
                                bool(self.reflow))
        return run(noise, weight)


# --------------------------------------------------------------------------- #
# Pure-JAX reference (mirrors the PyTorch module literally) for validation
# --------------------------------------------------------------------------- #
def reference_forward(noise, weight, sigmas, num_steps, cond_scale, reflow=False):
    sig = [float(s) for s in sigmas]

    def fn(x, sigma):
        B, C, H, W = x.shape
        xl = jnp.transpose(x, (0, 2, 3, 1)).reshape(-1, C).astype(jnp.float32)
        out = (cond_scale / (1.0 + sigma)) * jnp.dot(
            xl, weight, precision=jax.lax.Precision.HIGHEST)
        return jnp.transpose(out.reshape(B, H, W, C), (0, 3, 1, 2))

    x = sig[0] * noise
    old = None
    for i in range(num_steps):
        sigma, sigma_next, sigma_last = sig[i], sig[i + 1], sig[i - 1]
        den = fn(x, sigma)
        if reflow:
            den = x - den * sigma
        t = -math.log(sigma)
        t_next = -math.log(sigma_next) if sigma_next > 0 else math.inf
        h = t_next - t
        t_min, t_max = min(sigma_next, sigma), max(sigma_next, sigma)
        if old is None or sigma_next == 0:
            x = (t_min / t_max) * x - math.expm1(-h) * den
        else:
            h_last = t - (-math.log(sigma_last))
            h_min, h_max = min(h_last, h), max(h_last, h)
            r = h_max / h_min
            h_d = 0.5 * (h_max + h_min)
            den_d = (1.0 + 1.0 / (2.0 * r)) * den - (1.0 / (2.0 * r)) * old
            x = (t_min / t_max) * x - math.expm1(-h_d) * den_d
        old = den
    return jnp.clip(x, -1.0, 1.0)


# --------------------------------------------------------------------------- #
# Demo
# --------------------------------------------------------------------------- #
if __name__ == "__main__":
    key = jax.random.PRNGKey(0)
    B, C, H, W = 2, 4, 16, 16
    noise = jax.random.normal(key, (B, C, H, W), dtype=jnp.float32)
    net = make_net(C)

    num_steps = 6
    sigma_max, sigma_min = 10.0, 0.1
    ramp = [sigma_max - i * (sigma_max - sigma_min) / (num_steps - 1)
            for i in range(num_steps)]
    sigmas = ramp + [0.0]  # len == num_steps + 1, last == 0

    for reflow in (False, True):
        sampler = DPM2MSampler(num_steps=num_steps, cond_scale=1.0, reflow=reflow)
        out = sampler.forward(noise, fn=None, net=net, sigmas=sigmas)
        out = jax.block_until_ready(out)
        ref = jax.block_until_ready(
            reference_forward(noise, net["weight"], sigmas, num_steps, 1.0, reflow))

        assert out.shape == (B, C, H, W)
        assert out.dtype == jnp.float32
        assert bool(jnp.all(jnp.isfinite(out)))
        assert bool(jnp.all(out <= 1.0)) and bool(jnp.all(out >= -1.0))
        assert bool(jnp.allclose(out, ref, atol=1e-4, rtol=1e-4)), \
            float(jnp.max(jnp.abs(out - ref)))

        # Second call hits the lru_cache'd jitted sampler (no re-trace/compile).
        out2 = jax.block_until_ready(
            sampler.forward(noise, fn=None, net=net, sigmas=sigmas))
        assert bool(jnp.allclose(out, out2))

    print("KERNEL_OK")
</pallas_src>

<mosaic_0001>
module attributes {stable_mosaic.version = 11 : i64} {
  func.func @kernel(%arg0: i32, %arg1: memref<96xf32, #tpu.memory_space<smem>>, %arg2: memref<4x8x128xf32, #tpu.memory_space<vmem>>, %arg3: memref<4x8x128xf32, #tpu.memory_space<vmem>>) attributes {dimension_semantics = [#tpu.dimension_semantics<parallel>], iteration_bounds = array<i64: 1>, scalar_prefetch = 0 : i64, scratch_operands = 0 : i64, tpu.core_type = #tpu.core_type<tc>, window_params = [{transform_indices = @transform_0, window_bounds = array<i64: 96>}, {transform_indices = @transform_1, window_bounds = array<i64: 4, 8, 128>}, {transform_indices = @transform_2, window_bounds = array<i64: 4, 8, 128>}]} {
    %c0 = arith.constant 0 : index
    %c0_0 = arith.constant 0 : index
    %c0_1 = arith.constant 0 : index
    %0 = vector.load %arg2[%c0, %c0_0, %c0_1] : memref<4x8x128xf32, #tpu.memory_space<vmem>>, vector<1x8x128xf32>
    %1 = vector.shape_cast %0 : vector<1x8x128xf32> to vector<8x128xf32>
    %c1 = arith.constant 1 : index
    %c0_2 = arith.constant 0 : index
    %c0_3 = arith.constant 0 : index
    %2 = vector.load %arg2[%c1, %c0_2, %c0_3] : memref<4x8x128xf32, #tpu.memory_space<vmem>>, vector<1x8x128xf32>
    %3 = vector.shape_cast %2 : vector<1x8x128xf32> to vector<8x128xf32>
    %c2 = arith.constant 2 : index
    %c0_4 = arith.constant 0 : index
    %c0_5 = arith.constant 0 : index
    %4 = vector.load %arg2[%c2, %c0_4, %c0_5] : memref<4x8x128xf32, #tpu.memory_space<vmem>>, vector<1x8x128xf32>
    %5 = vector.shape_cast %4 : vector<1x8x128xf32> to vector<8x128xf32>
    %c3 = arith.constant 3 : index
    %c0_6 = arith.constant 0 : index
    %c0_7 = arith.constant 0 : index
    %6 = vector.load %arg2[%c3, %c0_6, %c0_7] : memref<4x8x128xf32, #tpu.memory_space<vmem>>, vector<1x8x128xf32>
    %7 = vector.shape_cast %6 : vector<1x8x128xf32> to vector<8x128xf32>
    %c0_8 = arith.constant 0 : index
    %8 = memref.load %arg1[%c0_8] : memref<96xf32, #tpu.memory_space<smem>>
    %9 = vector.broadcast %8 : f32 to vector<8x128xf32>
    %10 = arith.mulf %1, %9 : vector<8x128xf32>
    %c4 = arith.constant 4 : index
    %11 = memref.load %arg1[%c4] : memref<96xf32, #tpu.memory_space<smem>>
    %12 = vector.broadcast %11 : f32 to vector<8x128xf32>
    %13 = arith.mulf %3, %12 : vector<8x128xf32>
    %14 = arith.addf %10, %13 : vector<8x128xf32>
    %c8 = arith.constant 8 : index
    %15 = memref.load %arg1[%c8] : memref<96xf32, #tpu.memory_space<smem>>
    %16 = vector.broadcast %15 : f32 to vector<8x128xf32>
    %17 = arith.mulf %5, %16 : vector<8x128xf32>
    %18 = arith.addf %14, %17 : vector<8x128xf32>
    %c12 = arith.constant 12 : index
    %19 = memref.load %arg1[%c12] : memref<96xf32, #tpu.memory_space<smem>>
    %20 = vector.broadcast %19 : f32 to vector<8x128xf32>
    %21 = arith.mulf %7, %20 : vector<8x128xf32>
    %22 = arith.addf %18, %21 : vector<8x128xf32>
    %c1_9 = arith.constant 1 : index
    %23 = memref.load %arg1[%c1_9] : memref<96xf32, #tpu.memory_space<smem>>
    %24 = vector.broadcast %23 : f32 to vector<8x128xf32>
    %25 = arith.mulf %1, %24 : vector<8x128xf32>
    %c5 = arith.constant 5 : index
    %26 = memref.load %arg1[%c5] : memref<96xf32, #tpu.memory_space<smem>>
    %27 = vector.broadcast %26 : f32 to vector<8x128xf32>
    %28 = arith.mulf %3, %27 : vector<8x128xf32>
    %29 = arith.addf %25, %28 : vector<8x128xf32>
    %c9 = arith.constant 9 : index
    %30 = memref.load %arg1[%c9] : memref<96xf32, #tpu.memory_space<smem>>
    %31 = vector.broadcast %30 : f32 to vector<8x128xf32>
    %32 = arith.mulf %5, %31 : vector<8x128xf32>
    %33 = arith.addf %29, %32 : vector<8x128xf32>
    %c13 = arith.constant 13 : index
    %34 = memref.load %arg1[%c13] : memref<96xf32, #tpu.memory_space<smem>>
    %35 = vector.broadcast %34 : f32 to vector<8x128xf32>
    %36 = arith.mulf %7, %35 : vector<8x128xf32>
    %37 = arith.addf %33, %36 : vector<8x128xf32>
    %c2_10 = arith.constant 2 : index
    %38 = memref.load %arg1[%c2_10] : memref<96xf32, #tpu.memory_space<smem>>
    %39 = vector.broadcast %38 : f32 to vector<8x128xf32>
    %40 = arith.mulf %1, %39 : vector<8x128xf32>
    %c6 = arith.constant 6 : index
    %41 = memref.load %arg1[%c6] : memref<96xf32, #tpu.memory_space<smem>>
    %42 = vector.broadcast %41 : f32 to vector<8x128xf32>
    %43 = arith.mulf %3, %42 : vector<8x128xf32>
    %44 = arith.addf %40, %43 : vector<8x128xf32>
    %c10 = arith.constant 10 : index
    %45 = memref.load %arg1[%c10] : memref<96xf32, #tpu.memory_space<smem>>
    %46 = vector.broadcast %45 : f32 to vector<8x128xf32>
    %47 = arith.mulf %5, %46 : vector<8x128xf32>
    %48 = arith.addf %44, %47 : vector<8x128xf32>
    %c14 = arith.constant 14 : index
    %49 = memref.load %arg1[%c14] : memref<96xf32, #tpu.memory_space<smem>>
    %50 = vector.broadcast %49 : f32 to vector<8x128xf32>
    %51 = arith.mulf %7, %50 : vector<8x128xf32>
    %52 = arith.addf %48, %51 : vector<8x128xf32>
    %c3_11 = arith.constant 3 : index
    %53 = memref.load %arg1[%c3_11] : memref<96xf32, #tpu.memory_space<smem>>
    %54 = vector.broadcast %53 : f32 to vector<8x128xf32>
    %55 = arith.mulf %1, %54 : vector<8x128xf32>
    %c7 = arith.constant 7 : index
    %56 = memref.load %arg1[%c7] : memref<96xf32, #tpu.memory_space<smem>>
    %57 = vector.broadcast %56 : f32 to vector<8x128xf32>
    %58 = arith.mulf %3, %57 : vector<8x128xf32>
    %59 = arith.addf %55, %58 : vector<8x128xf32>
    %c11 = arith.constant 11 : index
    %60 = memref.load %arg1[%c11] : memref<96xf32, #tpu.memory_space<smem>>
    %61 = vector.broadcast %60 : f32 to vector<8x128xf32>
    %62 = arith.mulf %5, %61 : vector<8x128xf32>
    %63 = arith.addf %59, %62 : vector<8x128xf32>
    %c15 = arith.constant 15 : index
    %64 = memref.load %arg1[%c15] : memref<96xf32, #tpu.memory_space<smem>>
    %65 = vector.broadcast %64 : f32 to vector<8x128xf32>
    %66 = arith.mulf %7, %65 : vector<8x128xf32>
    %67 = arith.addf %63, %66 : vector<8x128xf32>
    %cst = arith.constant 8.020000e+00 : f32
    %68 = vector.broadcast %cst : f32 to vector<8x128xf32>
    %69 = arith.mulf %68, %1 : vector<8x128xf32>
    %cst_12 = arith.constant 1.980000e-01 : f32
    %70 = vector.broadcast %cst_12 : f32 to vector<8x128xf32>
    %71 = arith.mulf %70, %22 : vector<8x128xf32>
    %72 = arith.addf %69, %71 : vector<8x128xf32>
    %cst_13 = arith.constant 8.020000e+00 : f32
    %73 = vector.broadcast %cst_13 : f32 to vector<8x128xf32>
    %74 = arith.mulf %73, %3 : vector<8x128xf32>
    %cst_14 = arith.constant 1.980000e-01 : f32
    %75 = vector.broadcast %cst_14 : f32 to vector<8x128xf32>
    %76 = arith.mulf %75, %37 : vector<8x128xf32>
    %77 = arith.addf %74, %76 : vector<8x128xf32>
    %cst_15 = arith.constant 8.020000e+00 : f32
    %78 = vector.broadcast %cst_15 : f32 to vector<8x128xf32>
    %79 = arith.mulf %78, %5 : vector<8x128xf32>
    %cst_16 = arith.constant 1.980000e-01 : f32
    %80 = vector.broadcast %cst_16 : f32 to vector<8x128xf32>
    %81 = arith.mulf %80, %52 : vector<8x128xf32>
    %82 = arith.addf %79, %81 : vector<8x128xf32>
    %cst_17 = arith.constant 8.020000e+00 : f32
    %83 = vector.broadcast %cst_17 : f32 to vector<8x128xf32>
    %84 = arith.mulf %83, %7 : vector<8x128xf32>
    %cst_18 = arith.constant 1.980000e-01 : f32
    %85 = vector.broadcast %cst_18 : f32 to vector<8x128xf32>
    %86 = arith.mulf %85, %67 : vector<8x128xf32>
    %87 = arith.addf %84, %86 : vector<8x128xf32>
    %c16 = arith.constant 16 : index
    %88 = memref.load %arg1[%c16] : memref<96xf32, #tpu.memory_space<smem>>
    %89 = vector.broadcast %88 : f32 to vector<8x128xf32>
    %90 = arith.mulf %72, %89 : vector<8x128xf32>
    %c20 = arith.constant 20 : index
    %91 = memref.load %arg1[%c20] : memref<96xf32, #tpu.memory_space<smem>>
    %92 = vector.broadcast %91 : f32 to vector<8x128xf32>
    %93 = arith.mulf %77, %92 : vector<8x128xf32>
    %94 = arith.addf %90, %93 : vector<8x128xf32>
    %c24 = arith.constant 24 : index
    %95 = memref.load %arg1[%c24] : memref<96xf32, #tpu.memory_space<smem>>
    %96 = vector.broadcast %95 : f32 to vector<8x128xf32>
    %97 = arith.mulf %82, %96 : vector<8x128xf32>
    %98 = arith.addf %94, %97 : vector<8x128xf32>
    %c28 = arith.constant 28 : index
    %99 = memref.load %arg1[%c28] : memref<96xf32, #tpu.memory_space<smem>>
    %100 = vector.broadcast %99 : f32 to vector<8x128xf32>
    %101 = arith.mulf %87, %100 : vector<8x128xf32>
    %102 = arith.addf %98, %101 : vector<8x128xf32>
    %c17 = arith.constant 17 : index
    %103 = memref.load %arg1[%c17] : memref<96xf32, #tpu.memory_space<smem>>
    %104 = vector.broadcast %103 : f32 to vector<8x128xf32>
    %105 = arith.mulf %72, %104 : vector<8x128xf32>
    %c21 = arith.constant 21 : index
    %106 = memref.load %arg1[%c21] : memref<96xf32, #tpu.memory_space<smem>>
    %107 = vector.broadcast %106 : f32 to vector<8x128xf32>
    %108 = arith.mulf %77, %107 : vector<8x128xf32>
    %109 = arith.addf %105, %108 : vector<8x128xf32>
    %c25 = arith.constant 25 : index
    %110 = memref.load %arg1[%c25] : memref<96xf32, #tpu.memory_space<smem>>
    %111 = vector.broadcast %110 : f32 to vector<8x128xf32>
    %112 = arith.mulf %82, %111 : vector<8x128xf32>
    %113 = arith.addf %109, %112 : vector<8x128xf32>
    %c29 = arith.constant 29 : index
    %114 = memref.load %arg1[%c29] : memref<96xf32, #tpu.memory_space<smem>>
    %115 = vector.broadcast %114 : f32 to vector<8x128xf32>
    %116 = arith.mulf %87, %115 : vector<8x128xf32>
    %117 = arith.addf %113, %116 : vector<8x128xf32>
    %c18 = arith.constant 18 : index
    %118 = memref.load %arg1[%c18] : memref<96xf32, #tpu.memory_space<smem>>
    %119 = vector.broadcast %118 : f32 to vector<8x128xf32>
    %120 = arith.mulf %72, %119 : vector<8x128xf32>
    %c22 = arith.constant 22 : index
    %121 = memref.load %arg1[%c22] : memref<96xf32, #tpu.memory_space<smem>>
    %122 = vector.broadcast %121 : f32 to vector<8x128xf32>
    %123 = arith.mulf %77, %122 : vector<8x128xf32>
    %124 = arith.addf %120, %123 : vector<8x128xf32>
    %c26 = arith.constant 26 : index
    %125 = memref.load %arg1[%c26] : memref<96xf32, #tpu.memory_space<smem>>
    %126 = vector.broadcast %125 : f32 to vector<8x128xf32>
    %127 = arith.mulf %82, %126 : vector<8x128xf32>
    %128 = arith.addf %124, %127 : vector<8x128xf32>
    %c30 = arith.constant 30 : index
    %129 = memref.load %arg1[%c30] : memref<96xf32, #tpu.memory_space<smem>>
    %130 = vector.broadcast %129 : f32 to vector<8x128xf32>
    %131 = arith.mulf %87, %130 : vector<8x128xf32>
    %132 = arith.addf %128, %131 : vector<8x128xf32>
    %c19 = arith.constant 19 : index
    %133 = memref.load %arg1[%c19] : memref<96xf32, #tpu.memory_space<smem>>
    %134 = vector.broadcast %133 : f32 to vector<8x128xf32>
    %135 = arith.mulf %72, %134 : vector<8x128xf32>
    %c23 = arith.constant 23 : index
    %136 = memref.load %arg1[%c23] : memref<96xf32, #tpu.memory_space<smem>>
    %137 = vector.broadcast %136 : f32 to vector<8x128xf32>
    %138 = arith.mulf %77, %137 : vector<8x128xf32>
    %139 = arith.addf %135, %138 : vector<8x128xf32>
    %c27 = arith.constant 27 : index
    %140 = memref.load %arg1[%c27] : memref<96xf32, #tpu.memory_space<smem>>
    %141 = vector.broadcast %140 : f32 to vector<8x128xf32>
    %142 = arith.mulf %82, %141 : vector<8x128xf32>
    %143 = arith.addf %139, %142 : vector<8x128xf32>
    %c31 = arith.constant 31 : index
    %144 = memref.load %arg1[%c31] : memref<96xf32, #tpu.memory_space<smem>>
    %145 = vector.broadcast %144 : f32 to vector<8x128xf32>
    %146 = arith.mulf %87, %145 : vector<8x128xf32>
    %147 = arith.addf %143, %146 : vector<8x128xf32>
    %cst_19 = arith.constant 0.753117204 : f32
    %148 = vector.broadcast %cst_19 : f32 to vector<8x128xf32>
    %149 = arith.mulf %148, %72 : vector<8x128xf32>
    %cst_20 = arith.constant 0.309527159 : f32
    %150 = vector.broadcast %cst_20 : f32 to vector<8x128xf32>
    %151 = arith.mulf %150, %102 : vector<8x128xf32>
    %152 = arith.addf %149, %151 : vector<8x128xf32>
    %cst_21 = arith.constant -0.0867015272 : f32
    %153 = vector.broadcast %cst_21 : f32 to vector<8x128xf32>
    %154 = arith.mulf %153, %22 : vector<8x128xf32>
    %155 = arith.addf %152, %154 : vector<8x128xf32>
    %cst_22 = arith.constant 0.753117204 : f32
    %156 = vector.broadcast %cst_22 : f32 to vector<8x128xf32>
    %157 = arith.mulf %156, %77 : vector<8x128xf32>
    %cst_23 = arith.constant 0.309527159 : f32
    %158 = vector.broadcast %cst_23 : f32 to vector<8x128xf32>
    %159 = arith.mulf %158, %117 : vector<8x128xf32>
    %160 = arith.addf %157, %159 : vector<8x128xf32>
    %cst_24 = arith.constant -0.0867015272 : f32
    %161 = vector.broadcast %cst_24 : f32 to vector<8x128xf32>
    %162 = arith.mulf %161, %37 : vector<8x128xf32>
    %163 = arith.addf %160, %162 : vector<8x128xf32>
    %cst_25 = arith.constant 0.753117204 : f32
    %164 = vector.broadcast %cst_25 : f32 to vector<8x128xf32>
    %165 = arith.mulf %164, %82 : vector<8x128xf32>
    %cst_26 = arith.constant 0.309527159 : f32
    %166 = vector.broadcast %cst_26 : f32 to vector<8x128xf32>
    %167 = arith.mulf %166, %132 : vector<8x128xf32>
    %168 = arith.addf %165, %167 : vector<8x128xf32>
    %cst_27 = arith.constant -0.0867015272 : f32
    %169 = vector.broadcast %cst_27 : f32 to vector<8x128xf32>
    %170 = arith.mulf %169, %52 : vector<8x128xf32>
    %171 = arith.addf %168, %170 : vector<8x128xf32>
    %cst_28 = arith.constant 0.753117204 : f32
    %172 = vector.broadcast %cst_28 : f32 to vector<8x128xf32>
    %173 = arith.mulf %172, %87 : vector<8x128xf32>
    %cst_29 = arith.constant 0.309527159 : f32
    %174 = vector.broadcast %cst_29 : f32 to vector<8x128xf32>
    %175 = arith.mulf %174, %147 : vector<8x128xf32>
    %176 = arith.addf %173, %175 : vector<8x128xf32>
    %cst_30 = arith.constant -0.0867015272 : f32
    %177 = vector.broadcast %cst_30 : f32 to vector<8x128xf32>
    %178 = arith.mulf %177, %67 : vector<8x128xf32>
    %179 = arith.addf %176, %178 : vector<8x128xf32>
    %c32 = arith.constant 32 : index
    %180 = memref.load %arg1[%c32] : memref<96xf32, #tpu.memory_space<smem>>
    %181 = vector.broadcast %180 : f32 to vector<8x128xf32>
    %182 = arith.mulf %155, %181 : vector<8x128xf32>
    %c36 = arith.constant 36 : index
    %183 = memref.load %arg1[%c36] : memref<96xf32, #tpu.memory_space<smem>>
    %184 = vector.broadcast %183 : f32 to vector<8x128xf32>
    %185 = arith.mulf %163, %184 : vector<8x128xf32>
    %186 = arith.addf %182, %185 : vector<8x128xf32>
    %c40 = arith.constant 40 : index
    %187 = memref.load %arg1[%c40] : memref<96xf32, #tpu.memory_space<smem>>
    %188 = vector.broadcast %187 : f32 to vector<8x128xf32>
    %189 = arith.mulf %171, %188 : vector<8x128xf32>
    %190 = arith.addf %186, %189 : vector<8x128xf32>
    %c44 = arith.constant 44 : index
    %191 = memref.load %arg1[%c44] : memref<96xf32, #tpu.memory_space<smem>>
    %192 = vector.broadcast %191 : f32 to vector<8x128xf32>
    %193 = arith.mulf %179, %192 : vector<8x128xf32>
    %194 = arith.addf %190, %193 : vector<8x128xf32>
    %c33 = arith.constant 33 : index
    %195 = memref.load %arg1[%c33] : memref<96xf32, #tpu.memory_space<smem>>
    %196 = vector.broadcast %195 : f32 to vector<8x128xf32>
    %197 = arith.mulf %155, %196 : vector<8x128xf32>
    %c37 = arith.constant 37 : index
    %198 = memref.load %arg1[%c37] : memref<96xf32, #tpu.memory_space<smem>>
    %199 = vector.broadcast %198 : f32 to vector<8x128xf32>
    %200 = arith.mulf %163, %199 : vector<8x128xf32>
    %201 = arith.addf %197, %200 : vector<8x128xf32>
    %c41 = arith.constant 41 : index
    %202 = memref.load %arg1[%c41] : memref<96xf32, #tpu.memory_space<smem>>
    %203 = vector.broadcast %202 : f32 to vector<8x128xf32>
    %204 = arith.mulf %171, %203 : vector<8x128xf32>
    %205 = arith.addf %201, %204 : vector<8x128xf32>
    %c45 = arith.constant 45 : index
    %206 = memref.load %arg1[%c45] : memref<96xf32, #tpu.memory_space<smem>>
    %207 = vector.broadcast %206 : f32 to vector<8x128xf32>
    %208 = arith.mulf %179, %207 : vector<8x128xf32>
    %209 = arith.addf %205, %208 : vector<8x128xf32>
    %c34 = arith.constant 34 : index
    %210 = memref.load %arg1[%c34] : memref<96xf32, #tpu.memory_space<smem>>
    %211 = vector.broadcast %210 : f32 to vector<8x128xf32>
    %212 = arith.mulf %155, %211 : vector<8x128xf32>
    %c38 = arith.constant 38 : index
    %213 = memref.load %arg1[%c38] : memref<96xf32, #tpu.memory_space<smem>>
    %214 = vector.broadcast %213 : f32 to vector<8x128xf32>
    %215 = arith.mulf %163, %214 : vector<8x128xf32>
    %216 = arith.addf %212, %215 : vector<8x128xf32>
    %c42 = arith.constant 42 : index
    %217 = memref.load %arg1[%c42] : memref<96xf32, #tpu.memory_space<smem>>
    %218 = vector.broadcast %217 : f32 to vector<8x128xf32>
    %219 = arith.mulf %171, %218 : vector<8x128xf32>
    %220 = arith.addf %216, %219 : vector<8x128xf32>
    %c46 = arith.constant 46 : index
    %221 = memref.load %arg1[%c46] : memref<96xf32, #tpu.memory_space<smem>>
    %222 = vector.broadcast %221 : f32 to vector<8x128xf32>
    %223 = arith.mulf %179, %222 : vector<8x128xf32>
    %224 = arith.addf %220, %223 : vector<8x128xf32>
    %c35 = arith.constant 35 : index
    %225 = memref.load %arg1[%c35] : memref<96xf32, #tpu.memory_space<smem>>
    %226 = vector.broadcast %225 : f32 to vector<8x128xf32>
    %227 = arith.mulf %155, %226 : vector<8x128xf32>
    %c39 = arith.constant 39 : index
    %228 = memref.load %arg1[%c39] : memref<96xf32, #tpu.memory_space<smem>>
    %229 = vector.broadcast %228 : f32 to vector<8x128xf32>
    %230 = arith.mulf %163, %229 : vector<8x128xf32>
    %231 = arith.addf %227, %230 : vector<8x128xf32>
    %c43 = arith.constant 43 : index
    %232 = memref.load %arg1[%c43] : memref<96xf32, #tpu.memory_space<smem>>
    %233 = vector.broadcast %232 : f32 to vector<8x128xf32>
    %234 = arith.mulf %171, %233 : vector<8x128xf32>
    %235 = arith.addf %231, %234 : vector<8x128xf32>
    %c47 = arith.constant 47 : index
    %236 = memref.load %arg1[%c47] : memref<96xf32, #tpu.memory_space<smem>>
    %237 = vector.broadcast %236 : f32 to vector<8x128xf32>
    %238 = arith.mulf %179, %237 : vector<8x128xf32>
    %239 = arith.addf %235, %238 : vector<8x128xf32>
    %cst_31 = arith.constant 0.67218542 : f32
    %240 = vector.broadcast %cst_31 : f32 to vector<8x128xf32>
    %241 = arith.mulf %240, %155 : vector<8x128xf32>
    %cst_32 = arith.constant 0.391462862 : f32
    %242 = vector.broadcast %cst_32 : f32 to vector<8x128xf32>
    %243 = arith.mulf %242, %194 : vector<8x128xf32>
    %244 = arith.addf %241, %243 : vector<8x128xf32>
    %cst_33 = arith.constant -0.102964394 : f32
    %245 = vector.broadcast %cst_33 : f32 to vector<8x128xf32>
    %246 = arith.mulf %245, %102 : vector<8x128xf32>
    %247 = arith.addf %244, %246 : vector<8x128xf32>
    %cst_34 = arith.constant 0.67218542 : f32
    %248 = vector.broadcast %cst_34 : f32 to vector<8x128xf32>
    %249 = arith.mulf %248, %163 : vector<8x128xf32>
    %cst_35 = arith.constant 0.391462862 : f32
    %250 = vector.broadcast %cst_35 : f32 to vector<8x128xf32>
    %251 = arith.mulf %250, %209 : vector<8x128xf32>
    %252 = arith.addf %249, %251 : vector<8x128xf32>
    %cst_36 = arith.constant -0.102964394 : f32
    %253 = vector.broadcast %cst_36 : f32 to vector<8x128xf32>
    %254 = arith.mulf %253, %117 : vector<8x128xf32>
    %255 = arith.addf %252, %254 : vector<8x128xf32>
    %cst_37 = arith.constant 0.67218542 : f32
    %256 = vector.broadcast %cst_37 : f32 to vector<8x128xf32>
    %257 = arith.mulf %256, %171 : vector<8x128xf32>
    %cst_38 = arith.constant 0.391462862 : f32
    %258 = vector.broadcast %cst_38 : f32 to vector<8x128xf32>
    %259 = arith.mulf %258, %224 : vector<8x128xf32>
    %260 = arith.addf %257, %259 : vector<8x128xf32>
    %cst_39 = arith.constant -0.102964394 : f32
    %261 = vector.broadcast %cst_39 : f32 to vector<8x128xf32>
    %262 = arith.mulf %261, %132 : vector<8x128xf32>
    %263 = arith.addf %260, %262 : vector<8x128xf32>
    %cst_40 = arith.constant 0.67218542 : f32
    %264 = vector.broadcast %cst_40 : f32 to vector<8x128xf32>
    %265 = arith.mulf %264, %179 : vector<8x128xf32>
    %cst_41 = arith.constant 0.391462862 : f32
    %266 = vector.broadcast %cst_41 : f32 to vector<8x128xf32>
    %267 = arith.mulf %266, %239 : vector<8x128xf32>
    %268 = arith.addf %265, %267 : vector<8x128xf32>
    %cst_42 = arith.constant -0.102964394 : f32
    %269 = vector.broadcast %cst_42 : f32 to vector<8x128xf32>
    %270 = arith.mulf %269, %147 : vector<8x128xf32>
    %271 = arith.addf %268, %270 : vector<8x128xf32>
    %c48 = arith.constant 48 : index
    %272 = memref.load %arg1[%c48] : memref<96xf32, #tpu.memory_space<smem>>
    %273 = vector.broadcast %272 : f32 to vector<8x128xf32>
    %274 = arith.mulf %247, %273 : vector<8x128xf32>
    %c52 = arith.constant 52 : index
    %275 = memref.load %arg1[%c52] : memref<96xf32, #tpu.memory_space<smem>>
    %276 = vector.broadcast %275 : f32 to vector<8x128xf32>
    %277 = arith.mulf %255, %276 : vector<8x128xf32>
    %278 = arith.addf %274, %277 : vector<8x128xf32>
    %c56 = arith.constant 56 : index
    %279 = memref.load %arg1[%c56] : memref<96xf32, #tpu.memory_space<smem>>
    %280 = vector.broadcast %279 : f32 to vector<8x128xf32>
    %281 = arith.mulf %263, %280 : vector<8x128xf32>
    %282 = arith.addf %278, %281 : vector<8x128xf32>
    %c60 = arith.constant 60 : index
    %283 = memref.load %arg1[%c60] : memref<96xf32, #tpu.memory_space<smem>>
    %284 = vector.broadcast %283 : f32 to vector<8x128xf32>
    %285 = arith.mulf %271, %284 : vector<8x128xf32>
    %286 = arith.addf %282, %285 : vector<8x128xf32>
    %c49 = arith.constant 49 : index
    %287 = memref.load %arg1[%c49] : memref<96xf32, #tpu.memory_space<smem>>
    %288 = vector.broadcast %287 : f32 to vector<8x128xf32>
    %289 = arith.mulf %247, %288 : vector<8x128xf32>
    %c53 = arith.constant 53 : index
    %290 = memref.load %arg1[%c53] : memref<96xf32, #tpu.memory_space<smem>>
    %291 = vector.broadcast %290 : f32 to vector<8x128xf32>
    %292 = arith.mulf %255, %291 : vector<8x128xf32>
    %293 = arith.addf %289, %292 : vector<8x128xf32>
    %c57 = arith.constant 57 : index
    %294 = memref.load %arg1[%c57] : memref<96xf32, #tpu.memory_space<smem>>
    %295 = vector.broadcast %294 : f32 to vector<8x128xf32>
    %296 = arith.mulf %263, %295 : vector<8x128xf32>
    %297 = arith.addf %293, %296 : vector<8x128xf32>
    %c61 = arith.constant 61 : index
    %298 = memref.load %arg1[%c61] : memref<96xf32, #tpu.memory_space<smem>>
    %299 = vector.broadcast %298 : f32 to vector<8x128xf32>
    %300 = arith.mulf %271, %299 : vector<8x128xf32>
    %301 = arith.addf %297, %300 : vector<8x128xf32>
    %c50 = arith.constant 50 : index
    %302 = memref.load %arg1[%c50] : memref<96xf32, #tpu.memory_space<smem>>
    %303 = vector.broadcast %302 : f32 to vector<8x128xf32>
    %304 = arith.mulf %247, %303 : vector<8x128xf32>
    %c54 = arith.constant 54 : index
    %305 = memref.load %arg1[%c54] : memref<96xf32, #tpu.memory_space<smem>>
    %306 = vector.broadcast %305 : f32 to vector<8x128xf32>
    %307 = arith.mulf %255, %306 : vector<8x128xf32>
    %308 = arith.addf %304, %307 : vector<8x128xf32>
    %c58 = arith.constant 58 : index
    %309 = memref.load %arg1[%c58] : memref<96xf32, #tpu.memory_space<smem>>
    %310 = vector.broadcast %309 : f32 to vector<8x128xf32>
    %311 = arith.mulf %263, %310 : vector<8x128xf32>
    %312 = arith.addf %308, %311 : vector<8x128xf32>
    %c62 = arith.constant 62 : index
    %313 = memref.load %arg1[%c62] : memref<96xf32, #tpu.memory_space<smem>>
    %314 = vector.broadcast %313 : f32 to vector<8x128xf32>
    %315 = arith.mulf %271, %314 : vector<8x128xf32>
    %316 = arith.addf %312, %315 : vector<8x128xf32>
    %c51 = arith.constant 51 : index
    %317 = memref.load %arg1[%c51] : memref<96xf32, #tpu.memory_space<smem>>
    %318 = vector.broadcast %317 : f32 to vector<8x128xf32>
    %319 = arith.mulf %247, %318 : vector<8x128xf32>
    %c55 = arith.constant 55 : index
    %320 = memref.load %arg1[%c55] : memref<96xf32, #tpu.memory_space<smem>>
    %321 = vector.broadcast %320 : f32 to vector<8x128xf32>
    %322 = arith.mulf %255, %321 : vector<8x128xf32>
    %323 = arith.addf %319, %322 : vector<8x128xf32>
    %c59 = arith.constant 59 : index
    %324 = memref.load %arg1[%c59] : memref<96xf32, #tpu.memory_space<smem>>
    %325 = vector.broadcast %324 : f32 to vector<8x128xf32>
    %326 = arith.mulf %263, %325 : vector<8x128xf32>
    %327 = arith.addf %323, %326 : vector<8x128xf32>
    %c63 = arith.constant 63 : index
    %328 = memref.load %arg1[%c63] : memref<96xf32, #tpu.memory_space<smem>>
    %329 = vector.broadcast %328 : f32 to vector<8x128xf32>
    %330 = arith.mulf %271, %329 : vector<8x128xf32>
    %331 = arith.addf %327, %330 : vector<8x128xf32>
    %cst_43 = arith.constant 0.512315273 : f32
    %332 = vector.broadcast %cst_43 : f32 to vector<8x128xf32>
    %333 = arith.mulf %332, %247 : vector<8x128xf32>
    %cst_44 = arith.constant 0.535862923 : f32
    %334 = vector.broadcast %cst_44 : f32 to vector<8x128xf32>
    %335 = arith.mulf %334, %286 : vector<8x128xf32>
    %336 = arith.addf %333, %335 : vector<8x128xf32>
    %cst_45 = arith.constant -0.122694105 : f32
    %337 = vector.broadcast %cst_45 : f32 to vector<8x128xf32>
    %338 = arith.mulf %337, %194 : vector<8x128xf32>
    %339 = arith.addf %336, %338 : vector<8x128xf32>
    %cst_46 = arith.constant 0.512315273 : f32
    %340 = vector.broadcast %cst_46 : f32 to vector<8x128xf32>
    %341 = arith.mulf %340, %255 : vector<8x128xf32>
    %cst_47 = arith.constant 0.535862923 : f32
    %342 = vector.broadcast %cst_47 : f32 to vector<8x128xf32>
    %343 = arith.mulf %342, %301 : vector<8x128xf32>
    %344 = arith.addf %341, %343 : vector<8x128xf32>
    %cst_48 = arith.constant -0.122694105 : f32
    %345 = vector.broadcast %cst_48 : f32 to vector<8x128xf32>
    %346 = arith.mulf %345, %209 : vector<8x128xf32>
    %347 = arith.addf %344, %346 : vector<8x128xf32>
    %cst_49 = arith.constant 0.512315273 : f32
    %348 = vector.broadcast %cst_49 : f32 to vector<8x128xf32>
    %349 = arith.mulf %348, %263 : vector<8x128xf32>
    %cst_50 = arith.constant 0.535862923 : f32
    %350 = vector.broadcast %cst_50 : f32 to vector<8x128xf32>
    %351 = arith.mulf %350, %316 : vector<8x128xf32>
    %352 = arith.addf %349, %351 : vector<8x128xf32>
    %cst_51 = arith.constant -0.122694105 : f32
    %353 = vector.broadcast %cst_51 : f32 to vector<8x128xf32>
    %354 = arith.mulf %353, %224 : vector<8x128xf32>
    %355 = arith.addf %352, %354 : vector<8x128xf32>
    %cst_52 = arith.constant 0.512315273 : f32
    %356 = vector.broadcast %cst_52 : f32 to vector<8x128xf32>
    %357 = arith.mulf %356, %271 : vector<8x128xf32>
    %cst_53 = arith.constant 0.535862923 : f32
    %358 = vector.broadcast %cst_53 : f32 to vector<8x128xf32>
    %359 = arith.mulf %358, %331 : vector<8x128xf32>
    %360 = arith.addf %357, %359 : vector<8x128xf32>
    %cst_54 = arith.constant -0.122694105 : f32
    %361 = vector.broadcast %cst_54 : f32 to vector<8x128xf32>
    %362 = arith.mulf %361, %239 : vector<8x128xf32>
    %363 = arith.addf %360, %362 : vector<8x128xf32>
    %c64 = arith.constant 64 : index
    %364 = memref.load %arg1[%c64] : memref<96xf32, #tpu.memory_space<smem>>
    %365 = vector.broadcast %364 : f32 to vector<8x128xf32>
    %366 = arith.mulf %339, %365 : vector<8x128xf32>
    %c68 = arith.constant 68 : index
    %367 = memref.load %arg1[%c68] : memref<96xf32, #tpu.memory_space<smem>>
    %368 = vector.broadcast %367 : f32 to vector<8x128xf32>
    %369 = arith.mulf %347, %368 : vector<8x128xf32>
    %370 = arith.addf %366, %369 : vector<8x128xf32>
    %c72 = arith.constant 72 : index
    %371 = memref.load %arg1[%c72] : memref<96xf32, #tpu.memory_space<smem>>
    %372 = vector.broadcast %371 : f32 to vector<8x128xf32>
    %373 = arith.mulf %355, %372 : vector<8x128xf32>
    %374 = arith.addf %370, %373 : vector<8x128xf32>
    %c76 = arith.constant 76 : index
    %375 = memref.load %arg1[%c76] : memref<96xf32, #tpu.memory_space<smem>>
    %376 = vector.broadcast %375 : f32 to vector<8x128xf32>
    %377 = arith.mulf %363, %376 : vector<8x128xf32>
    %378 = arith.addf %374, %377 : vector<8x128xf32>
    %c65 = arith.constant 65 : index
    %379 = memref.load %arg1[%c65] : memref<96xf32, #tpu.memory_space<smem>>
    %380 = vector.broadcast %379 : f32 to vector<8x128xf32>
    %381 = arith.mulf %339, %380 : vector<8x128xf32>
    %c69 = arith.constant 69 : index
    %382 = memref.load %arg1[%c69] : memref<96xf32, #tpu.memory_space<smem>>
    %383 = vector.broadcast %382 : f32 to vector<8x128xf32>
    %384 = arith.mulf %347, %383 : vector<8x128xf32>
    %385 = arith.addf %381, %384 : vector<8x128xf32>
    %c73 = arith.constant 73 : index
    %386 = memref.load %arg1[%c73] : memref<96xf32, #tpu.memory_space<smem>>
    %387 = vector.broadcast %386 : f32 to vector<8x128xf32>
    %388 = arith.mulf %355, %387 : vector<8x128xf32>
    %389 = arith.addf %385, %388 : vector<8x128xf32>
    %c77 = arith.constant 77 : index
    %390 = memref.load %arg1[%c77] : memref<96xf32, #tpu.memory_space<smem>>
    %391 = vector.broadcast %390 : f32 to vector<8x128xf32>
    %392 = arith.mulf %363, %391 : vector<8x128xf32>
    %393 = arith.addf %389, %392 : vector<8x128xf32>
    %c66 = arith.constant 66 : index
    %394 = memref.load %arg1[%c66] : memref<96xf32, #tpu.memory_space<smem>>
    %395 = vector.broadcast %394 : f32 to vector<8x128xf32>
    %396 = arith.mulf %339, %395 : vector<8x128xf32>
    %c70 = arith.constant 70 : index
    %397 = memref.load %arg1[%c70] : memref<96xf32, #tpu.memory_space<smem>>
    %398 = vector.broadcast %397 : f32 to vector<8x128xf32>
    %399 = arith.mulf %347, %398 : vector<8x128xf32>
    %400 = arith.addf %396, %399 : vector<8x128xf32>
    %c74 = arith.constant 74 : index
    %401 = memref.load %arg1[%c74] : memref<96xf32, #tpu.memory_space<smem>>
    %402 = vector.broadcast %401 : f32 to vector<8x128xf32>
    %403 = arith.mulf %355, %402 : vector<8x128xf32>
    %404 = arith.addf %400, %403 : vector<8x128xf32>
    %c78 = arith.constant 78 : index
    %405 = memref.load %arg1[%c78] : memref<96xf32, #tpu.memory_space<smem>>
    %406 = vector.broadcast %405 : f32 to vector<8x128xf32>
    %407 = arith.mulf %363, %406 : vector<8x128xf32>
    %408 = arith.addf %404, %407 : vector<8x128xf32>
    %c67 = arith.constant 67 : index
    %409 = memref.load %arg1[%c67] : memref<96xf32, #tpu.memory_space<smem>>
    %410 = vector.broadcast %409 : f32 to vector<8x128xf32>
    %411 = arith.mulf %339, %410 : vector<8x128xf32>
    %c71 = arith.constant 71 : index
    %412 = memref.load %arg1[%c71] : memref<96xf32, #tpu.memory_space<smem>>
    %413 = vector.broadcast %412 : f32 to vector<8x128xf32>
    %414 = arith.mulf %347, %413 : vector<8x128xf32>
    %415 = arith.addf %411, %414 : vector<8x128xf32>
    %c75 = arith.constant 75 : index
    %416 = memref.load %arg1[%c75] : memref<96xf32, #tpu.memory_space<smem>>
    %417 = vector.broadcast %416 : f32 to vector<8x128xf32>
    %418 = arith.mulf %355, %417 : vector<8x128xf32>
    %419 = arith.addf %415, %418 : vector<8x128xf32>
    %c79 = arith.constant 79 : index
    %420 = memref.load %arg1[%c79] : memref<96xf32, #tpu.memory_space<smem>>
    %421 = vector.broadcast %420 : f32 to vector<8x128xf32>
    %422 = arith.mulf %363, %421 : vector<8x128xf32>
    %423 = arith.addf %419, %422 : vector<8x128xf32>
    %cst_55 = arith.constant 0.0480769239 : f32
    %424 = vector.broadcast %cst_55 : f32 to vector<8x128xf32>
    %425 = arith.mulf %424, %339 : vector<8x128xf32>
    %cst_56 = arith.constant 0.93595159 : f32
    %426 = vector.broadcast %cst_56 : f32 to vector<8x128xf32>
    %427 = arith.mulf %426, %378 : vector<8x128xf32>
    %428 = arith.addf %425, %427 : vector<8x128xf32>
    %cst_57 = arith.constant -0.0928927809 : f32
    %429 = vector.broadcast %cst_57 : f32 to vector<8x128xf32>
    %430 = arith.mulf %429, %286 : vector<8x128xf32>
    %431 = arith.addf %428, %430 : vector<8x128xf32>
    %cst_58 = arith.constant 0.0480769239 : f32
    %432 = vector.broadcast %cst_58 : f32 to vector<8x128xf32>
    %433 = arith.mulf %432, %347 : vector<8x128xf32>
    %cst_59 = arith.constant 0.93595159 : f32
    %434 = vector.broadcast %cst_59 : f32 to vector<8x128xf32>
    %435 = arith.mulf %434, %393 : vector<8x128xf32>
    %436 = arith.addf %433, %435 : vector<8x128xf32>
    %cst_60 = arith.constant -0.0928927809 : f32
    %437 = vector.broadcast %cst_60 : f32 to vector<8x128xf32>
    %438 = arith.mulf %437, %301 : vector<8x128xf32>
    %439 = arith.addf %436, %438 : vector<8x128xf32>
    %cst_61 = arith.constant 0.0480769239 : f32
    %440 = vector.broadcast %cst_61 : f32 to vector<8x128xf32>
    %441 = arith.mulf %440, %355 : vector<8x128xf32>
    %cst_62 = arith.constant 0.93595159 : f32
    %442 = vector.broadcast %cst_62 : f32 to vector<8x128xf32>
    %443 = arith.mulf %442, %408 : vector<8x128xf32>
    %444 = arith.addf %441, %443 : vector<8x128xf32>
    %cst_63 = arith.constant -0.0928927809 : f32
    %445 = vector.broadcast %cst_63 : f32 to vector<8x128xf32>
    %446 = arith.mulf %445, %316 : vector<8x128xf32>
    %447 = arith.addf %444, %446 : vector<8x128xf32>
    %cst_64 = arith.constant 0.0480769239 : f32
    %448 = vector.broadcast %cst_64 : f32 to vector<8x128xf32>
    %449 = arith.mulf %448, %363 : vector<8x128xf32>
    %cst_65 = arith.constant 0.93595159 : f32
    %450 = vector.broadcast %cst_65 : f32 to vector<8x128xf32>
    %451 = arith.mulf %450, %423 : vector<8x128xf32>
    %452 = arith.addf %449, %451 : vector<8x128xf32>
    %cst_66 = arith.constant -0.0928927809 : f32
    %453 = vector.broadcast %cst_66 : f32 to vector<8x128xf32>
    %454 = arith.mulf %453, %331 : vector<8x128xf32>
    %455 = arith.addf %452, %454 : vector<8x128xf32>
    %c80 = arith.constant 80 : index
    %456 = memref.load %arg1[%c80] : memref<96xf32, #tpu.memory_space<smem>>
    %457 = vector.broadcast %456 : f32 to vector<8x128xf32>
    %458 = arith.mulf %431, %457 : vector<8x128xf32>
    %c84 = arith.constant 84 : index
    %459 = memref.load %arg1[%c84] : memref<96xf32, #tpu.memory_space<smem>>
    %460 = vector.broadcast %459 : f32 to vector<8x128xf32>
    %461 = arith.mulf %439, %460 : vector<8x128xf32>
    %462 = arith.addf %458, %461 : vector<8x128xf32>
    %c88 = arith.constant 88 : index
    %463 = memref.load %arg1[%c88] : memref<96xf32, #tpu.memory_space<smem>>
    %464 = vector.broadcast %463 : f32 to vector<8x128xf32>
    %465 = arith.mulf %447, %464 : vector<8x128xf32>
    %466 = arith.addf %462, %465 : vector<8x128xf32>
    %c92 = arith.constant 92 : index
    %467 = memref.load %arg1[%c92] : memref<96xf32, #tpu.memory_space<smem>>
    %468 = vector.broadcast %467 : f32 to vector<8x128xf32>
    %469 = arith.mulf %455, %468 : vector<8x128xf32>
    %470 = arith.addf %466, %469 : vector<8x128xf32>
    %c81 = arith.constant 81 : index
    %471 = memref.load %arg1[%c81] : memref<96xf32, #tpu.memory_space<smem>>
    %472 = vector.broadcast %471 : f32 to vector<8x128xf32>
    %473 = arith.mulf %431, %472 : vector<8x128xf32>
    %c85 = arith.constant 85 : index
    %474 = memref.load %arg1[%c85] : memref<96xf32, #tpu.memory_space<smem>>
    %475 = vector.broadcast %474 : f32 to vector<8x128xf32>
    %476 = arith.mulf %439, %475 : vector<8x128xf32>
    %477 = arith.addf %473, %476 : vector<8x128xf32>
    %c89 = arith.constant 89 : index
    %478 = memref.load %arg1[%c89] : memref<96xf32, #tpu.memory_space<smem>>
    %479 = vector.broadcast %478 : f32 to vector<8x128xf32>
    %480 = arith.mulf %447, %479 : vector<8x128xf32>
    %481 = arith.addf %477, %480 : vector<8x128xf32>
    %c93 = arith.constant 93 : index
    %482 = memref.load %arg1[%c93] : memref<96xf32, #tpu.memory_space<smem>>
    %483 = vector.broadcast %482 : f32 to vector<8x128xf32>
    %484 = arith.mulf %455, %483 : vector<8x128xf32>
    %485 = arith.addf %481, %484 : vector<8x128xf32>
    %c82 = arith.constant 82 : index
    %486 = memref.load %arg1[%c82] : memref<96xf32, #tpu.memory_space<smem>>
    %487 = vector.broadcast %486 : f32 to vector<8x128xf32>
    %488 = arith.mulf %431, %487 : vector<8x128xf32>
    %c86 = arith.constant 86 : index
    %489 = memref.load %arg1[%c86] : memref<96xf32, #tpu.memory_space<smem>>
    %490 = vector.broadcast %489 : f32 to vector<8x128xf32>
    %491 = arith.mulf %439, %490 : vector<8x128xf32>
    %492 = arith.addf %488, %491 : vector<8x128xf32>
    %c90 = arith.constant 90 : index
    %493 = memref.load %arg1[%c90] : memref<96xf32, #tpu.memory_space<smem>>
    %494 = vector.broadcast %493 : f32 to vector<8x128xf32>
    %495 = arith.mulf %447, %494 : vector<8x128xf32>
    %496 = arith.addf %492, %495 : vector<8x128xf32>
    %c94 = arith.constant 94 : index
    %497 = memref.load %arg1[%c94] : memref<96xf32, #tpu.memory_space<smem>>
    %498 = vector.broadcast %497 : f32 to vector<8x128xf32>
    %499 = arith.mulf %455, %498 : vector<8x128xf32>
    %500 = arith.addf %496, %499 : vector<8x128xf32>
    %c83 = arith.constant 83 : index
    %501 = memref.load %arg1[%c83] : memref<96xf32, #tpu.memory_space<smem>>
    %502 = vector.broadcast %501 : f32 to vector<8x128xf32>
    %503 = arith.mulf %431, %502 : vector<8x128xf32>
    %c87 = arith.constant 87 : index
    %504 = memref.load %arg1[%c87] : memref<96xf32, #tpu.memory_space<smem>>
    %505 = vector.broadcast %504 : f32 to vector<8x128xf32>
    %506 = arith.mulf %439, %505 : vector<8x128xf32>
    %507 = arith.addf %503, %506 : vector<8x128xf32>
    %c91 = arith.constant 91 : index
    %508 = memref.load %arg1[%c91] : memref<96xf32, #tpu.memory_space<smem>>
    %509 = vector.broadcast %508 : f32 to vector<8x128xf32>
    %510 = arith.mulf %447, %509 : vector<8x128xf32>
    %511 = arith.addf %507, %510 : vector<8x128xf32>
    %c95 = arith.constant 95 : index
    %512 = memref.load %arg1[%c95] : memref<96xf32, #tpu.memory_space<smem>>
    %513 = vector.broadcast %512 : f32 to vector<8x128xf32>
    %514 = arith.mulf %455, %513 : vector<8x128xf32>
    %515 = arith.addf %511, %514 : vector<8x128xf32>
    %cst_67 = arith.constant 0.000000e+00 : f32
    %516 = vector.broadcast %cst_67 : f32 to vector<8x128xf32>
    %517 = arith.mulf %516, %431 : vector<8x128xf32>
    %cst_68 = arith.constant 1.000000e+00 : f32
    %518 = vector.broadcast %cst_68 : f32 to vector<8x128xf32>
    %519 = arith.mulf %518, %470 : vector<8x128xf32>
    %520 = arith.addf %517, %519 : vector<8x128xf32>
    %cst_69 = arith.constant 0.000000e+00 : f32
    %521 = vector.broadcast %cst_69 : f32 to vector<8x128xf32>
    %522 = arith.mulf %521, %439 : vector<8x128xf32>
    %cst_70 = arith.constant 1.000000e+00 : f32
    %523 = vector.broadcast %cst_70 : f32 to vector<8x128xf32>
    %524 = arith.mulf %523, %485 : vector<8x128xf32>
    %525 = arith.addf %522, %524 : vector<8x128xf32>
    %cst_71 = arith.constant 0.000000e+00 : f32
    %526 = vector.broadcast %cst_71 : f32 to vector<8x128xf32>
    %527 = arith.mulf %526, %447 : vector<8x128xf32>
    %cst_72 = arith.constant 1.000000e+00 : f32
    %528 = vector.broadcast %cst_72 : f32 to vector<8x128xf32>
    %529 = arith.mulf %528, %500 : vector<8x128xf32>
    %530 = arith.addf %527, %529 : vector<8x128xf32>
    %cst_73 = arith.constant 0.000000e+00 : f32
    %531 = vector.broadcast %cst_73 : f32 to vector<8x128xf32>
    %532 = arith.mulf %531, %455 : vector<8x128xf32>
    %cst_74 = arith.constant 1.000000e+00 : f32
    %533 = vector.broadcast %cst_74 : f32 to vector<8x128xf32>
    %534 = arith.mulf %533, %515 : vector<8x128xf32>
    %535 = arith.addf %532, %534 : vector<8x128xf32>
    %cst_75 = arith.constant -1.000000e+00 : f32
    %cst_76 = arith.constant 1.000000e+00 : f32
    %536 = vector.broadcast %cst_75 : f32 to vector<8x128xf32>
    %537 = arith.maximumf %536, %520 : vector<8x128xf32>
    %538 = vector.broadcast %cst_76 : f32 to vector<8x128xf32>
    %539 = arith.minimumf %538, %537 : vector<8x128xf32>
    %c0_77 = arith.constant 0 : index
    %c0_78 = arith.constant 0 : index
    %c0_79 = arith.constant 0 : index
    %540 = vector.load %arg3[%c0_77, %c0_78, %c0_79] : memref<4x8x128xf32, #tpu.memory_space<vmem>>, vector<1x8x128xf32>
    %541 = vector.shape_cast %540 : vector<1x8x128xf32> to vector<8x128xf32>
    %542 = vector.shape_cast %539 : vector<8x128xf32> to vector<1x8x128xf32>
    tpu.vector_store %arg3[%c0_77, %c0_78, %c0_79], %542 {strides = array<i32>} : memref<4x8x128xf32, #tpu.memory_space<vmem>>, vector<1x8x128xf32>,
    %cst_80 = arith.constant -1.000000e+00 : f32
    %cst_81 = arith.constant 1.000000e+00 : f32
    %543 = vector.broadcast %cst_80 : f32 to vector<8x128xf32>
    %544 = arith.maximumf %543, %525 : vector<8x128xf32>
    %545 = vector.broadcast %cst_81 : f32 to vector<8x128xf32>
    %546 = arith.minimumf %545, %544 : vector<8x128xf32>
    %c1_82 = arith.constant 1 : index
    %c0_83 = arith.constant 0 : index
    %c0_84 = arith.constant 0 : index
    %547 = vector.load %arg3[%c1_82, %c0_83, %c0_84] : memref<4x8x128xf32, #tpu.memory_space<vmem>>, vector<1x8x128xf32>
    %548 = vector.shape_cast %547 : vector<1x8x128xf32> to vector<8x128xf32>
    %549 = vector.shape_cast %546 : vector<8x128xf32> to vector<1x8x128xf32>
    tpu.vector_store %arg3[%c1_82, %c0_83, %c0_84], %549 {strides = array<i32>} : memref<4x8x128xf32, #tpu.memory_space<vmem>>, vector<1x8x128xf32>,
    %cst_85 = arith.constant -1.000000e+00 : f32
    %cst_86 = arith.constant 1.000000e+00 : f32
    %550 = vector.broadcast %cst_85 : f32 to vector<8x128xf32>
    %551 = arith.maximumf %550, %530 : vector<8x128xf32>
    %552 = vector.broadcast %cst_86 : f32 to vector<8x128xf32>
    %553 = arith.minimumf %552, %551 : vector<8x128xf32>
    %c2_87 = arith.constant 2 : index
    %c0_88 = arith.constant 0 : index
    %c0_89 = arith.constant 0 : index
    %554 = vector.load %arg3[%c2_87, %c0_88, %c0_89] : memref<4x8x128xf32, #tpu.memory_space<vmem>>, vector<1x8x128xf32>
    %555 = vector.shape_cast %554 : vector<1x8x128xf32> to vector<8x128xf32>
    %556 = vector.shape_cast %553 : vector<8x128xf32> to vector<1x8x128xf32>
    tpu.vector_store %arg3[%c2_87, %c0_88, %c0_89], %556 {strides = array<i32>} : memref<4x8x128xf32, #tpu.memory_space<vmem>>, vector<1x8x128xf32>,
    %cst_90 = arith.constant -1.000000e+00 : f32
    %cst_91 = arith.constant 1.000000e+00 : f32
    %557 = vector.broadcast %cst_90 : f32 to vector<8x128xf32>
    %558 = arith.maximumf %557, %535 : vector<8x128xf32>
    %559 = vector.broadcast %cst_91 : f32 to vector<8x128xf32>
    %560 = arith.minimumf %559, %558 : vector<8x128xf32>
    %c3_92 = arith.constant 3 : index
    %c0_93 = arith.constant 0 : index
    %c0_94 = arith.constant 0 : index
    %561 = vector.load %arg3[%c3_92, %c0_93, %c0_94] : memref<4x8x128xf32, #tpu.memory_space<vmem>>, vector<1x8x128xf32>
    %562 = vector.shape_cast %561 : vector<1x8x128xf32> to vector<8x128xf32>
    %563 = vector.shape_cast %560 : vector<8x128xf32> to vector<1x8x128xf32>
    tpu.vector_store %arg3[%c3_92, %c0_93, %c0_94], %563 {strides = array<i32>} : memref<4x8x128xf32, #tpu.memory_space<vmem>>, vector<1x8x128xf32>,
    return
  }
  func.func @transform_0(%arg0: i32) -> i32 {
    %c0_i32 = arith.constant 0 : i32
    %c0_i32_0 = arith.constant 0 : i32
    return %c0_i32 : i32
  }
  func.func @transform_1(%arg0: i32) -> (i32, i32, i32) {
    %c0_i32 = arith.constant 0 : i32
    %c0_i32_0 = arith.constant 0 : i32
    %c0_i32_1 = arith.constant 0 : i32
    return %c0_i32, %arg0, %c0_i32_0 : i32, i32, i32
  }
  func.func @transform_2(%arg0: i32) -> (i32, i32, i32) {
    %c0_i32 = arith.constant 0 : i32
    %c0_i32_0 = arith.constant 0 : i32
    %c0_i32_1 = arith.constant 0 : i32
    return %c0_i32, %arg0, %c0_i32_0 : i32, i32, i32
  }
}

</mosaic_0001>

<bundles_post_ra>
// kernel: run.1
= control target key start
LH: loop header
LB: loop body
LE: loop exit
PB: predicated region body
PF: predicated region fallthrough
CT: control target
= control target key end

     0   :  { %7 = vsyncpa [#allocation3], 0  ;;  %s1040_s0 = inlined_call_operand.vmem [shape: f32[96], index: 0, kind: input, shape index: {}]   ;;  %s1041_s1 = inlined_call_operand.vmem [shape: f32[4,8,128], index: 1, kind: input, shape index: {}]   ;;  %s1042_s2 = inlined_call_operand.vmem [shape: f32[4,8,128], index: 2, kind: output, shape index: {}]  }
   0x1   :  { %s14_s11 = sshll.u32 %s1040_s0, 4  ;;  %s15_s11 = int_to_ptr.vmem [resolvable:$true] %s14_s11 }
   0x2   :  { %s617_s12 = scalar_lea.vmem %s15_s11, 16  ;;  %p622_p1 = scmp.lt.s32.totalorder %s15_s11, %s15_s11 }
   0x3   :  { %p618_p0 = scmp.ne.s32.totalorder %s15_s11, %s617_s12  ;;  %p623_p2 = scmp.lt.s32.totalorder %s617_s12, %s617_s12 }
   0x5   :  { %p624_p3 = por %p623_p2, %p622_p1 }
   0x7   :  { %p625_p4 = pnand %p624_p3, %p618_p0 }
   0x9   :  { %628 = shalt.err (!%p625_p4)
}
   0xa   :  { %s631_s13 = smov [#allocation2]  }
   0xb   :  { %17 = dma.vmem_to_smem %s15_s11, 16, %s631_s13, [#allocation3]  }
   0xc   :  { %629 = dma.done.wait [#allocation3], 16  }
   0xd   :  { %630 = vsyncadd [#allocation3], 4294967280 }
   0xe   :  { %23 = sfence }
   0xf   :  { %s31_s14 = sld [smem:[#allocation2]]  ;;  %s514_s15 = sld [smem:[#allocation2 + $0x4]]  ;;  %v653_v0 = vld [vmem:[%s1041_s1] sm:$0xff]  ;;  %v511_v1 = vld [vmem:[%s1041_s1 + $0x8] sm:$0xff]  ;;  %v661_v2 = vld [vmem:[%s1041_s1 + $0x10] sm:$0xff] }
  0x10   :  { %s515_s16 = sld [smem:[#allocation2 + $0x8]]  ;;  %s516_s0 = sld [smem:[#allocation2 + $0xc]]  ;;  %v670_v3 = vld [vmem:[%s1041_s1 + $0x18] sm:$0xff]  ;;  %v677_v4 = vmul.f32 8.02, %v653_v0 }
  0x11   :  { %s517_s19 = sld [smem:[#allocation2 + $0x1]]  ;;  %s663_s24 = sld [smem:[#allocation2 + $0x5]]  ;;  %v683_v5 = vmul.f32 8.02, %v511_v1  ;;  %v690_v7 = vmul.f32 8.02, %v661_v2 }
  0x12   :  { %s665_s25 = sld [smem:[#allocation2 + $0x9]]  ;;  %s672_s28 = sld [smem:[#allocation2 + $0xd]]  ;;  %v698_v11 = vmul.f32 8.02, %v670_v3 }
  0x13   :  { %s674_s29 = sld [smem:[#allocation2 + $0x2]]  ;;  %s679_s30 = sld [smem:[#allocation2 + $0x6]] }
  0x14   :  { %s681_s3 = sld [smem:[#allocation2 + $0xa]]  ;;  %s685_s4 = sld [smem:[#allocation2 + $0xe]] }
  0x15   :  { %v32_v6 = vstv %s31_s14  ;;  %s687_s5 = sld [smem:[#allocation2 + $0x3]]  ;;  %v35_v9 = vstv %s514_s15  ;;  %s693_s1 = sld [smem:[#allocation2 + $0x7]] }
  0x16   :  { %v33_v8 = vmul.f32 %v32_v6, %v653_v0  ;;  %v39_v10 = vstv %s515_s16  ;;  %s695_s6 = sld [smem:[#allocation2 + $0xb]]  ;;  %v36_v12 = vmul.f32 %v511_v1, %v35_v9  ;;  %v43_v14 = vstv %s516_s0  ;;  %s701_s7 = sld [smem:[#allocation2 + $0xf]] }
  0x17   :  { %v40_v13 = vmul.f32 %v661_v2, %v39_v10  ;;  %v47_v15 = vstv %s517_s19  ;;  %v44_v16 = vmul.f32 %v670_v3, %v43_v14  ;;  %v50_v18 = vstv %s663_s24  ;;  %s707_s8 = sld [smem:[#allocation2 + $0x10]]  ;;  %s709_s9 = sld [smem:[#allocation2 + $0x14]] }
  0x18   :  { %v48_v17 = vmul.f32 %v47_v15, %v653_v0  ;;  %v54_v19 = vstv %s665_s25  ;;  %v37_v20 = vadd.f32 %v36_v12, %v33_v8  ;;  %v51_v21 = vmul.f32 %v511_v1, %v50_v18  ;;  %s713_s10 = sld [smem:[#allocation2 + $0x18]]  ;;  %s715_s11 = sld [smem:[#allocation2 + $0x1c]] }
  0x19   :  { %v55_v22 = vmul.f32 %v661_v2, %v54_v19  ;;  %v58_v23 = vstv %s672_s28  ;;  %v62_v25 = vstv %s674_s29  ;;  %v65_v26 = vstv %s679_s30  ;;  %s721_s12 = sld [smem:[#allocation2 + $0x11]]  ;;  %s723_s13 = sld [smem:[#allocation2 + $0x15]] }
  0x1a   :  { %v59_v24 = vmul.f32 %v670_v3, %v58_v23  ;;  %v69_v27 = vstv %s681_s3  ;;  %v41_v28 = vadd.f32 %v40_v13, %v37_v20  ;;  %v52_v29 = vadd.f32 %v51_v21, %v48_v17  ;;  %s726_s14 = sld [smem:[#allocation2 + $0x19]]  ;;  %s728_s15 = sld [smem:[#allocation2 + $0x1d]] }
  0x1b   :  { %v63_v30 = vmul.f32 %v62_v25, %v653_v0  ;;  %v66_v31 = vmul.f32 %v511_v1, %v65_v26  ;;  %v70_v32 = vmul.f32 %v661_v2, %v69_v27  ;;  %v73_v33 = vstv %s685_s4  ;;  %s734_s16 = sld [smem:[#allocation2 + $0x12]]  ;;  %s739_s17 = sld [smem:[#allocation2 + $0x16]] }
  0x1c   :  { %v77_v34 = vstv %s687_s5  ;;  %v80_v35 = vstv %s693_s1  ;;  %v736_v36 = vadd.f32 %v44_v16, %v41_v28  ;;  %v56_v37 = vadd.f32 %v55_v22, %v52_v29  ;;  %s744_s18 = sld [smem:[#allocation2 + $0x1a]]  ;;  %s746_s0 = sld [smem:[#allocation2 + $0x1e]] }
  0x1d   :  { %v67_v38 = vadd.f32 %v66_v31, %v63_v30  ;;  %v74_v39 = vmul.f32 %v670_v3, %v73_v33  ;;  %v78_v40 = vmul.f32 %v77_v34, %v653_v0  ;;  %v81_v41 = vmul.f32 %v511_v1, %v80_v35  ;;  %s755_s19 = sld [smem:[#allocation2 + $0x13]]  ;;  %s762_s20 = sld [smem:[#allocation2 + $0x17]] }
  0x1e   :  { %v84_v42 = vstv %s695_s6  ;;  %v88_v43 = vstv %s701_s7  ;;  %v748_v44 = vadd.f32 %v59_v24, %v56_v37  ;;  %v92_v49 = vmul.f32 0.198, %v736_v36  ;;  %s771_s21 = sld [smem:[#allocation2 + $0x1b]]  ;;  %s773_s22 = sld [smem:[#allocation2 + $0x1f]] }
  0x1f   :  { %v71_v45 = vadd.f32 %v70_v32, %v67_v38  ;;  %v85_v46 = vmul.f32 %v661_v2, %v84_v42  ;;  %v89_v47 = vmul.f32 %v670_v3, %v88_v43  ;;  %v82_v48 = vadd.f32 %v81_v41, %v78_v40  ;;  %s782_s23 = sld [smem:[#allocation2 + $0x20]]  ;;  %s784_s24 = sld [smem:[#allocation2 + $0x24]] }
  0x20   :  { %v104_v50 = vstv %s707_s8  ;;  %v107_v51 = vstv %s709_s9  ;;  %v95_v53 = vmul.f32 0.198, %v748_v44  ;;  %v111_v54 = vstv %s713_s10  ;;  %s787_s25 = sld [smem:[#allocation2 + $0x28]]  ;;  %s789_s26 = sld [smem:[#allocation2 + $0x2c]] }
  0x21   :  { %v757_v52 = vadd.f32 %v74_v39, %v71_v45  ;;  %v115_v55 = vstv %s715_s11  ;;  %v86_v56 = vadd.f32 %v85_v46, %v82_v48  ;;  %v93_v57 = vadd.f32 %v92_v49, %v677_v4  ;;  %s791_s27 = sld [smem:[#allocation2 + $0x21]]  ;;  %s793_s28 = sld [smem:[#allocation2 + $0x25]] }
  0x22   :  { %v119_v58 = vstv %s721_s12  ;;  %v122_v59 = vstv %s723_s13  ;;  %v96_v60 = vadd.f32 %v95_v53, %v683_v5  ;;  %v126_v62 = vstv %s726_s14  ;;  %s797_s29 = sld [smem:[#allocation2 + $0x29]]  ;;  %s799_s30 = sld [smem:[#allocation2 + $0x2d]] }
  0x23   :  { %v98_v61 = vmul.f32 0.198, %v757_v52  ;;  %v130_v63 = vstv %s728_s15  ;;  %v90_v0 = vadd.f32 %v89_v47, %v86_v56  ;;  %v105_v1 = vmul.f32 %v104_v50, %v93_v57  ;;  %s805_s3 = sld [smem:[#allocation2 + $0x22]]  ;;  %s807_s4 = sld [smem:[#allocation2 + $0x26]] }
  0x24   :  { %v120_v2 = vmul.f32 %v119_v58, %v93_v57  ;;  %v134_v3 = vstv %s734_s16  ;;  %v108_v6 = vmul.f32 %v107_v51, %v96_v60  ;;  %v123_v8 = vmul.f32 %v122_v59, %v96_v60  ;;  %s810_s5 = sld [smem:[#allocation2 + $0x2a]]  ;;  %s819_s1 = sld [smem:[#allocation2 + $0x2e]] }
  0x25   :  { %v99_v4 = vadd.f32 %v98_v61, %v690_v7  ;;  %v135_v5 = vmul.f32 %v134_v3, %v93_v57  ;;  %v101_v9 = vmul.f32 0.198, %v90_v0  ;;  %v137_v10 = vstv %s739_s17  ;;  %s826_s6 = sld [smem:[#allocation2 + $0x23]]  ;;  %s829_s7 = sld [smem:[#allocation2 + $0x27]] }
  0x26   :  { %v141_v12 = vstv %s744_s18  ;;  %v145_v13 = vstv %s746_s0  ;;  %v109_v14 = vadd.f32 %v108_v6, %v105_v1  ;;  %v124_v16 = vadd.f32 %v123_v8, %v120_v2  ;;  %s831_s8 = sld [smem:[#allocation2 + $0x2b]]  ;;  %s837_s9 = sld [smem:[#allocation2 + $0x2f]] }
  0x27   :  { %v112_v15 = vmul.f32 %v111_v54, %v99_v4  ;;  %v127_v17 = vmul.f32 %v126_v62, %v99_v4  ;;  %v102_v18 = vadd.f32 %v101_v9, %v698_v11  ;;  %v138_v19 = vmul.f32 %v137_v10, %v96_v60  ;;  %s844_s10 = sld [smem:[#allocation2 + $0x30]]  ;;  %s846_s11 = sld [smem:[#allocation2 + $0x34]] }
  0x28   :  { %v142_v20 = vmul.f32 %v141_v12, %v99_v4  ;;  %v149_v21 = vstv %s755_s19  ;;  %v152_v24 = vstv %s762_s20  ;;  %v156_v29 = vstv %s771_s21  ;;  %s848_s12 = sld [smem:[#allocation2 + $0x38]]  ;;  %s853_s13 = sld [smem:[#allocation2 + $0x3c]] }
  0x29   :  { %v113_v7 = vadd.f32 %v112_v15, %v109_v14  ;;  %v128_v22 = vadd.f32 %v127_v17, %v124_v16  ;;  %v150_v23 = vmul.f32 %v149_v21, %v93_v57  ;;  %v116_v25 = vmul.f32 %v115_v55, %v102_v18  ;;  %s855_s14 = sld [smem:[#allocation2 + $0x31]]  ;;  %s861_s15 = sld [smem:[#allocation2 + $0x35]] }
  0x2a   :  { %v131_v26 = vmul.f32 %v130_v63, %v102_v18  ;;  %v139_v11 = vadd.f32 %v138_v19, %v135_v5  ;;  %v146_v27 = vmul.f32 %v145_v13, %v102_v18  ;;  %v153_v28 = vmul.f32 %v152_v24, %v96_v60  ;;  %s863_s16 = sld [smem:[#allocation2 + $0x39]]  ;;  %s866_s17 = sld [smem:[#allocation2 + $0x3d]] }
  0x2b   :  { %v160_v30 = vstv %s773_s22  ;;  %v163_v31 = vmul.f32 0.7531172, %v93_v57  ;;  %v801_v32 = vadd.f32 %v116_v25, %v113_v7  ;;  %v157_v35 = vmul.f32 %v156_v29, %v99_v4  ;;  %s868_s18 = sld [smem:[#allocation2 + $0x32]]  ;;  %s872_s0 = sld [smem:[#allocation2 + $0x36]] }
  0x2c   :  { %v803_v33 = vadd.f32 %v131_v26, %v128_v22  ;;  %v143_v34 = vadd.f32 %v142_v20, %v139_v11  ;;  %v154_v37 = vadd.f32 %v153_v28, %v150_v23  ;;  %v161_v38 = vmul.f32 %v160_v30, %v102_v18  ;;  %s879_s19 = sld [smem:[#allocation2 + $0x3a]]  ;;  %s887_s20 = sld [smem:[#allocation2 + $0x3e]] }
  0x2d   :  { %v166_v39 = vmul.f32 -0.08670153, %v736_v36  ;;  %v168_v40 = vmul.f32 0.7531172, %v96_v60  ;;  %v164_v42 = vmul.f32 0.30952716, %v801_v32  ;;  %v184_v55 = vstv %s782_s23 }
  0x2e   :  { %v812_v41 = vadd.f32 %v146_v27, %v143_v34  ;;  %v169_v43 = vmul.f32 0.30952716, %v803_v33  ;;  %v171_v45 = vmul.f32 -0.08670153, %v748_v44  ;;  %v158_v46 = vadd.f32 %v157_v35, %v154_v37  ;;  %s889_s21 = sld [smem:[#allocation2 + $0x33]]  ;;  %s893_s22 = sld [smem:[#allocation2 + $0x37]] }
  0x2f   :  { %v173_v47 = vmul.f32 0.7531172, %v99_v4  ;;  %v176_v48 = vmul.f32 -0.08670153, %v757_v52  ;;  %v178_v36 = vmul.f32 0.7531172, %v102_v18  ;;  %v165_v49 = vadd.f32 %v164_v42, %v163_v31 }
  0x30   :  { %v170_v50 = vadd.f32 %v169_v43, %v168_v40  ;;  %v174_v51 = vmul.f32 0.30952716, %v812_v41  ;;  %v181_v53 = vmul.f32 -0.08670153, %v90_v0  ;;  %v821_v54 = vadd.f32 %v161_v38, %v158_v46  ;;  %s898_s23 = sld [smem:[#allocation2 + $0x3b]] }
  0x31   :  { %v187_v44 = vstv %s784_s24  ;;  %v191_v56 = vstv %s787_s25  ;;  %v167_v57 = vadd.f32 %v166_v39, %v165_v49  ;;  %v195_v59 = vstv %s789_s26  ;;  %s900_s24 = sld [smem:[#allocation2 + $0x3f]]  ;;  %s907_s25 = sld [smem:[#allocation2 + $0x40]] }
  0x32   :  { %v172_v52 = vadd.f32 %v171_v45, %v170_v50  ;;  %v175_v58 = vadd.f32 %v174_v51, %v173_v47  ;;  %v179_v60 = vmul.f32 0.30952716, %v821_v54  ;;  %v199_v61 = vstv %s791_s27  ;;  %s911_s26 = sld [smem:[#allocation2 + $0x44]]  ;;  %s913_s27 = sld [smem:[#allocation2 + $0x48]] }
  0x33   :  { %v202_v62 = vstv %s793_s28  ;;  %v206_v63 = vstv %s797_s29  ;;  %v185_v1 = vmul.f32 %v184_v55, %v167_v57  ;;  %v200_v3 = vmul.f32 %v199_v61, %v167_v57  ;;  %s916_s28 = sld [smem:[#allocation2 + $0x4c]]  ;;  %s918_s29 = sld [smem:[#allocation2 + $0x41]] }
  0x34   :  { %v177_v0 = vadd.f32 %v176_v48, %v175_v58  ;;  %v188_v2 = vmul.f32 %v187_v44, %v172_v52  ;;  %v180_v4 = vadd.f32 %v179_v60, %v178_v36  ;;  %v203_v6 = vmul.f32 %v202_v62, %v172_v52 }
  0x35   :  { %v210_v8 = vstv %s799_s30  ;;  %v214_v5 = vstv %s805_s3  ;;  %v217_v16 = vstv %s807_s4  ;;  %v221_v17 = vstv %s810_s5  ;;  %s925_s30 = sld [smem:[#allocation2 + $0x45]]  ;;  %s927_s3 = sld [smem:[#allocation2 + $0x49]] }
  0x36   :  { %v189_v9 = vadd.f32 %v188_v2, %v185_v1  ;;  %v192_v10 = vmul.f32 %v191_v56, %v177_v0  ;;  %v207_v12 = vmul.f32 %v206_v63, %v177_v0  ;;  %v215_v13 = vmul.f32 %v214_v5, %v167_v57  ;;  %s930_s4 = sld [smem:[#allocation2 + $0x4d]]  ;;  %s932_s5 = sld [smem:[#allocation2 + $0x42]] }
  0x37   :  { %v182_v14 = vadd.f32 %v181_v53, %v180_v4  ;;  %v204_v15 = vadd.f32 %v203_v6, %v200_v3  ;;  %v218_v19 = vmul.f32 %v217_v16, %v172_v52  ;;  %v222_v20 = vmul.f32 %v221_v17, %v177_v0 }
  0x38   :  { %v193_v18 = vadd.f32 %v192_v10, %v189_v9  ;;  %v225_v21 = vstv %s819_s1  ;;  %v229_v26 = vstv %s826_s6  ;;  %v232_v11 = vstv %s829_s7  ;;  %s936_s1 = sld [smem:[#allocation2 + $0x46]]  ;;  %s943_s6 = sld [smem:[#allocation2 + $0x4a]] }
  0x39   :  { %v196_v7 = vmul.f32 %v195_v59, %v182_v14  ;;  %v208_v22 = vadd.f32 %v207_v12, %v204_v15  ;;  %v211_v23 = vmul.f32 %v210_v8, %v182_v14  ;;  %v226_v24 = vmul.f32 %v225_v21, %v182_v14  ;;  %s951_s7 = sld [smem:[#allocation2 + $0x4e]] }
  0x3a   :  { %v219_v25 = vadd.f32 %v218_v19, %v215_v13  ;;  %v236_v27 = vstv %s831_s8  ;;  %v230_v30 = vmul.f32 %v229_v26, %v167_v57  ;;  %v233_v31 = vmul.f32 %v232_v11, %v172_v52  ;;  %s953_s8 = sld [smem:[#allocation2 + $0x43]] }
  0x3b   :  { %v857_v28 = vadd.f32 %v196_v7, %v193_v18  ;;  %v859_v29 = vadd.f32 %v211_v23, %v208_v22  ;;  %v237_v35 = vmul.f32 %v236_v27, %v177_v0  ;;  %v240_v37 = vstv %s837_s9  ;;  %s957_s9 = sld [smem:[#allocation2 + $0x47]] }
  0x3c   :  { %v223_v34 = vadd.f32 %v222_v20, %v219_v25  ;;  %v243_v38 = vmul.f32 0.6721854, %v167_v57  ;;  %v234_v39 = vadd.f32 %v233_v31, %v230_v30  ;;  %v241_v40 = vmul.f32 %v240_v37, %v182_v14 }
  0x3d   :  { %v244_v42 = vmul.f32 0.39146286, %v857_v28  ;;  %v246_v43 = vmul.f32 -0.102964394, %v801_v32  ;;  %v248_v46 = vmul.f32 0.6721854, %v172_v52  ;;  %v264_v57 = vstv %s844_s10 }
  0x3e   :  { %v874_v45 = vadd.f32 %v226_v24, %v223_v34  ;;  %v249_v47 = vmul.f32 0.39146286, %v859_v29  ;;  %v251_v48 = vmul.f32 -0.102964394, %v803_v33  ;;  %v238_v36 = vadd.f32 %v237_v35, %v234_v39  ;;  %s962_s10 = sld [smem:[#allocation2 + $0x4b]] }
  0x3f   :  { %v245_v49 = vadd.f32 %v244_v42, %v243_v38  ;;  %v253_v50 = vmul.f32 0.6721854, %v177_v0  ;;  %v256_v51 = vmul.f32 -0.102964394, %v812_v41  ;;  %v258_v55 = vmul.f32 0.6721854, %v182_v14 }
  0x40   :  { %v250_v32 = vadd.f32 %v249_v47, %v248_v46  ;;  %v254_v53 = vmul.f32 0.39146286, %v874_v45  ;;  %v261_v44 = vmul.f32 -0.102964394, %v821_v54  ;;  %v883_v56 = vadd.f32 %v241_v40, %v238_v36 }
  0x41   :  { %v247_v33 = vadd.f32 %v246_v43, %v245_v49  ;;  %v267_v52 = vstv %s846_s11  ;;  %v271_v59 = vstv %s848_s12  ;;  %v275_v60 = vstv %s853_s13  ;;  %s964_s11 = sld [smem:[#allocation2 + $0x4f]]  ;;  %s971_s12 = sld [smem:[#allocation2 + $0x50]] }
  0x42   :  { %v252_v41 = vadd.f32 %v251_v48, %v250_v32  ;;  %v255_v58 = vadd.f32 %v254_v53, %v253_v50  ;;  %v259_v54 = vmul.f32 0.39146286, %v883_v56  ;;  %v279_v62 = vstv %s855_s14  ;;  %s975_s13 = sld [smem:[#allocation2 + $0x54]]  ;;  %s977_s14 = sld [smem:[#allocation2 + $0x58]] }
  0x43   :  { %v265_v61 = vmul.f32 %v264_v57, %v247_v33  ;;  %v282_v63 = vstv %s861_s15  ;;  %v280_v2 = vmul.f32 %v279_v62, %v247_v33  ;;  %v286_v6 = vstv %s863_s16  ;;  %s980_s15 = sld [smem:[#allocation2 + $0x5c]]  ;;  %s982_s16 = sld [smem:[#allocation2 + $0x51]] }
  0x44   :  { %v257_v0 = vadd.f32 %v256_v51, %v255_v58  ;;  %v268_v1 = vmul.f32 %v267_v52, %v252_v41  ;;  %v283_v3 = vmul.f32 %v282_v63, %v252_v41  ;;  %v260_v4 = vadd.f32 %v259_v54, %v258_v55 }
  0x45   :  { %v290_v8 = vstv %s866_s17  ;;  %v294_v5 = vstv %s868_s18  ;;  %v297_v16 = vstv %s872_s0  ;;  %v301_v17 = vstv %s879_s19  ;;  %s985_s17 = sld [smem:[#allocation2 + $0x55]]  ;;  %s987_s18 = sld [smem:[#allocation2 + $0x59]] }
  0x46   :  { %v269_v9 = vadd.f32 %v268_v1, %v265_v61  ;;  %v272_v10 = vmul.f32 %v271_v59, %v257_v0  ;;  %v284_v12 = vadd.f32 %v283_v3, %v280_v2  ;;  %v287_v13 = vmul.f32 %v286_v6, %v257_v0  ;;  %s990_s0 = sld [smem:[#allocation2 + $0x5d]]  ;;  %s992_s19 = sld [smem:[#allocation2 + $0x52]] }
  0x47   :  { %v262_v14 = vadd.f32 %v261_v44, %v260_v4  ;;  %v295_v15 = vmul.f32 %v294_v5, %v247_v33  ;;  %v298_v20 = vmul.f32 %v297_v16, %v252_v41  ;;  %v302_v21 = vmul.f32 %v301_v17, %v257_v0 }
  0x48   :  { %v273_v18 = vadd.f32 %v272_v10, %v269_v9  ;;  %v288_v19 = vadd.f32 %v287_v13, %v284_v12  ;;  %v305_v23 = vstv %s887_s20  ;;  %v309_v24 = vstv %s889_s21  ;;  %s995_s20 = sld [smem:[#allocation2 + $0x56]]  ;;  %s999_s21 = sld [smem:[#allocation2 + $0x5a]] }
  0x49   :  { %v276_v7 = vmul.f32 %v275_v60, %v262_v14  ;;  %v291_v22 = vmul.f32 %v290_v8, %v262_v14  ;;  %v299_v25 = vadd.f32 %v298_v20, %v295_v15  ;;  %v306_v26 = vmul.f32 %v305_v23, %v262_v14 }
  0x4a   :  { %v310_v11 = vmul.f32 %v309_v24, %v247_v33  ;;  %v312_v27 = vstv %s893_s22  ;;  %v316_v35 = vstv %s898_s23  ;;  %v320_v39 = vstv %s900_s24  ;;  %s1004_s22 = sld [smem:[#allocation2 + $0x5e]]  ;;  %s1006_s23 = sld [smem:[#allocation2 + $0x53]] }
  0x4b   :  { %v920_v30 = vadd.f32 %v276_v7, %v273_v18  ;;  %v922_v31 = vadd.f32 %v291_v22, %v288_v19  ;;  %v313_v34 = vmul.f32 %v312_v27, %v252_v41  ;;  %v303_v37 = vadd.f32 %v302_v21, %v299_v25  ;;  %s1010_s24 = sld [smem:[#allocation2 + $0x57]] }
  0x4c   :  { %v317_v38 = vmul.f32 %v316_v35, %v257_v0  ;;  %v323_v40 = vmul.f32 0.5123153, %v247_v33  ;;  %v321_v43 = vmul.f32 %v320_v39, %v262_v14  ;;  %v326_v47 = vmul.f32 -0.122694105, %v857_v28 }
  0x4d   :  { %v314_v42 = vadd.f32 %v313_v34, %v310_v11  ;;  %v324_v46 = vmul.f32 0.5358629, %v920_v30  ;;  %v938_v48 = vadd.f32 %v306_v26, %v303_v37  ;;  %v328_v36 = vmul.f32 0.5123153, %v252_v41 }
  0x4e   :  { %v329_v49 = vmul.f32 0.5358629, %v922_v31  ;;  %v331_v50 = vmul.f32 -0.122694105, %v859_v29  ;;  %v333_v53 = vmul.f32 0.5123153, %v257_v0  ;;  %v344_v41 = vstv %s907_s25 }
  0x4f   :  { %v318_v51 = vadd.f32 %v317_v38, %v314_v42  ;;  %v325_v32 = vadd.f32 %v324_v46, %v323_v40  ;;  %v336_v55 = vmul.f32 -0.122694105, %v874_v45  ;;  %v334_v44 = vmul.f32 0.5358629, %v938_v48  ;;  %s1014_s25 = sld [smem:[#allocation2 + $0x5b]] }
  0x50   :  { %v330_v28 = vadd.f32 %v329_v49, %v328_v36  ;;  %v338_v33 = vmul.f32 0.5123153, %v262_v14  ;;  %v341_v57 = vmul.f32 -0.122694105, %v883_v56  ;;  %v347_v58 = vstv %s911_s26  ;;  %s1016_s26 = sld [smem:[#allocation2 + $0x5f]] }
  0x51   :  { %v947_v52 = vadd.f32 %v321_v43, %v318_v51  ;;  %v327_v29 = vadd.f32 %v326_v47, %v325_v32  ;;  %v335_v59 = vadd.f32 %v334_v44, %v333_v53  ;;  %v351_v60 = vstv %s913_s27 }
  0x52   :  { %v332_v45 = vadd.f32 %v331_v50, %v330_v28  ;;  %v355_v54 = vstv %s916_s28  ;;  %v359_v62 = vstv %s918_s29  ;;  %v362_v63 = vstv %s925_s30 }
  0x53   :  { %v339_v56 = vmul.f32 0.5358629, %v947_v52  ;;  %v345_v61 = vmul.f32 %v344_v41, %v327_v29  ;;  %v337_v0 = vadd.f32 %v336_v55, %v335_v59  ;;  %v360_v2 = vmul.f32 %v359_v62, %v327_v29 }
  0x54   :  { %v348_v1 = vmul.f32 %v347_v58, %v332_v45  ;;  %v363_v3 = vmul.f32 %v362_v63, %v332_v45  ;;  %v366_v6 = vstv %s927_s3  ;;  %v370_v8 = vstv %s930_s4 }
  0x55   :  { %v340_v4 = vadd.f32 %v339_v56, %v338_v33  ;;  %v374_v5 = vstv %s932_s5  ;;  %v352_v10 = vmul.f32 %v351_v60, %v337_v0  ;;  %v367_v13 = vmul.f32 %v366_v6, %v337_v0 }
  0x56   :  { %v349_v9 = vadd.f32 %v348_v1, %v345_v61  ;;  %v364_v12 = vadd.f32 %v363_v3, %v360_v2  ;;  %v375_v15 = vmul.f32 %v374_v5, %v327_v29  ;;  %v377_v16 = vstv %s936_s1 }
  0x57   :  { %v342_v14 = vadd.f32 %v341_v57, %v340_v4  ;;  %v381_v17 = vstv %s943_s6  ;;  %v378_v20 = vmul.f32 %v377_v16, %v332_v45  ;;  %v385_v23 = vstv %s951_s7 }
  0x58   :  { %v353_v18 = vadd.f32 %v352_v10, %v349_v9  ;;  %v368_v19 = vadd.f32 %v367_v13, %v364_v12  ;;  %v382_v21 = vmul.f32 %v381_v17, %v337_v0  ;;  %v389_v24 = vstv %s953_s8 }
  0x59   :  { %v356_v7 = vmul.f32 %v355_v54, %v342_v14  ;;  %v371_v22 = vmul.f32 %v370_v8, %v342_v14  ;;  %v379_v25 = vadd.f32 %v378_v20, %v375_v15  ;;  %v386_v26 = vmul.f32 %v385_v23, %v342_v14 }
  0x5a   :  { %v390_v11 = vmul.f32 %v389_v24, %v327_v29  ;;  %v392_v27 = vstv %s957_s9  ;;  %v396_v38 = vstv %s962_s10  ;;  %v400_v42 = vstv %s964_s11 }
  0x5b   :  { %v357_v34 = vadd.f32 %v356_v7, %v353_v18  ;;  %v372_v35 = vadd.f32 %v371_v22, %v368_v19  ;;  %v393_v37 = vmul.f32 %v392_v27, %v332_v45  ;;  %v383_v39 = vadd.f32 %v382_v21, %v379_v25 }
  0x5c   :  { %v397_v40 = vmul.f32 %v396_v38, %v337_v0  ;;  %v403_v43 = vmul.f32 0.048076924, %v327_v29  ;;  %v401_v47 = vmul.f32 %v400_v42, %v342_v14  ;;  %v406_v49 = vmul.f32 -0.09289278, %v920_v30 }
  0x5d   :  { %v394_v46 = vadd.f32 %v393_v37, %v390_v11  ;;  %v404_v36 = vmul.f32 0.9359516, %v357_v34  ;;  %v387_v50 = vadd.f32 %v386_v26, %v383_v39  ;;  %v408_v51 = vmul.f32 0.048076924, %v332_v45 }
  0x5e   :  { %v409_v32 = vmul.f32 0.9359516, %v372_v35  ;;  %v411_v53 = vmul.f32 -0.09289278, %v922_v31  ;;  %v413_v44 = vmul.f32 0.048076924, %v337_v0  ;;  %v424_v59 = vstv %s971_s12 }
  0x5f   :  { %v398_v55 = vadd.f32 %v397_v40, %v394_v46  ;;  %v405_v28 = vadd.f32 %v404_v36, %v403_v43  ;;  %v416_v33 = vmul.f32 -0.09289278, %v938_v48  ;;  %v414_v30 = vmul.f32 0.9359516, %v387_v50 }
  0x60   :  { %v410_v57 = vadd.f32 %v409_v32, %v408_v51  ;;  %v418_v29 = vmul.f32 0.048076924, %v342_v14  ;;  %v421_v41 = vmul.f32 -0.09289278, %v947_v52  ;;  %v427_v31 = vstv %s975_s13 }
  0x61   :  { %v402_v58 = vadd.f32 %v401_v47, %v398_v55  ;;  %v407_v45 = vadd.f32 %v406_v49, %v405_v28  ;;  %v415_v48 = vadd.f32 %v414_v30, %v413_v44  ;;  %v431_v54 = vstv %s977_s14 }
  0x62   :  { %v412_v60 = vadd.f32 %v411_v53, %v410_v57  ;;  %v435_v56 = vstv %s980_s15  ;;  %v439_v52 = vstv %s982_s16  ;;  %v442_v63 = vstv %s985_s17 }
  0x63   :  { %v419_v61 = vmul.f32 0.9359516, %v402_v58  ;;  %v425_v62 = vmul.f32 %v424_v59, %v407_v45  ;;  %v417_v0 = vadd.f32 %v416_v33, %v415_v48  ;;  %v440_v2 = vmul.f32 %v439_v52, %v407_v45 }
  0x64   :  { %v428_v1 = vmul.f32 %v427_v31, %v412_v60  ;;  %v443_v3 = vmul.f32 %v442_v63, %v412_v60  ;;  %v446_v6 = vstv %s987_s18  ;;  %v450_v8 = vstv %s990_s0 }
  0x65   :  { %v420_v4 = vadd.f32 %v419_v61, %v418_v29  ;;  %v454_v5 = vstv %s992_s19  ;;  %v432_v10 = vmul.f32 %v431_v54, %v417_v0  ;;  %v447_v13 = vmul.f32 %v446_v6, %v417_v0 }
  0x66   :  { %v429_v9 = vadd.f32 %v428_v1, %v425_v62  ;;  %v444_v12 = vadd.f32 %v443_v3, %v440_v2  ;;  %v455_v15 = vmul.f32 %v454_v5, %v407_v45  ;;  %v457_v16 = vstv %s995_s20 }
  0x67   :  { %v422_v14 = vadd.f32 %v421_v41, %v420_v4  ;;  %v461_v17 = vstv %s999_s21  ;;  %v458_v20 = vmul.f32 %v457_v16, %v412_v60  ;;  %v465_v23 = vstv %s1004_s22 }
  0x68   :  { %v433_v18 = vadd.f32 %v432_v10, %v429_v9  ;;  %v448_v19 = vadd.f32 %v447_v13, %v444_v12  ;;  %v462_v21 = vmul.f32 %v461_v17, %v417_v0  ;;  %v469_v24 = vstv %s1006_s23 }
  0x69   :  { %v436_v7 = vmul.f32 %v435_v56, %v422_v14  ;;  %v451_v22 = vmul.f32 %v450_v8, %v422_v14  ;;  %v459_v25 = vadd.f32 %v458_v20, %v455_v15  ;;  %v466_v26 = vmul.f32 %v465_v23, %v422_v14 }
  0x6a   :  { %v470_v11 = vmul.f32 %v469_v24, %v407_v45  ;;  %v472_v27 = vstv %s1010_s24  ;;  %v476_v38 = vstv %s1014_s25  ;;  %v480_v42 = vstv %s1016_s26 }
  0x6b   :  { %v437_v34 = vadd.f32 %v436_v7, %v433_v18  ;;  %v452_v35 = vadd.f32 %v451_v22, %v448_v19  ;;  %v473_v37 = vmul.f32 %v472_v27, %v412_v60  ;;  %v463_v39 = vadd.f32 %v462_v21, %v459_v25 }
  0x6c   :  { %v477_v40 = vmul.f32 %v476_v38, %v417_v0  ;;  %v483_v43 = vmul.f32 0.0, %v407_v45  ;;  %v481_v47 = vmul.f32 %v480_v42, %v422_v14  ;;  %v485_v36 = vmul.f32 0.0, %v412_v60 }
  0x6d   :  { %v474_v46 = vadd.f32 %v473_v37, %v470_v11  ;;  %v487_v49 = vmul.f32 0.0, %v417_v0  ;;  %v467_v50 = vadd.f32 %v466_v26, %v463_v39  ;;  %v489_v55 = vmul.f32 0.0, %v422_v14 }
  0x6e   :  { %v484_v51 = vadd.f32 %v483_v43, %v437_v34  ;;  %v486_v53 = vadd.f32 %v485_v36, %v452_v35 }
  0x6f   :  { %v478_v32 = vadd.f32 %v477_v40, %v474_v46  ;;  %v488_v28 = vadd.f32 %v487_v49, %v467_v50 }
  0x70   :  { %v609_v44 = vclamps-f32 %v484_v51, 1.0  ;;  %v610_v57 = vclamps-f32 %v486_v53, 1.0 }
  0x71   :  { %v482_v33 = vadd.f32 %v481_v47, %v478_v32  ;;  %v612_v30 = vclamps-f32 %v488_v28, 1.0 }
  0x72   :  { %493 = vst [vmem:[%s1042_s2] sm:$0xff] %v609_v44  ;;  %611 = vst [vmem:[%s1042_s2 + $0x8] sm:$0xff] %v610_v57 }
  0x73   :  { %v490_v29 = vadd.f32 %v489_v55, %v482_v33  ;;  %613 = vst [vmem:[%s1042_s2 + $0x10] sm:$0xff] %v612_v30 }
  0x75   :  { %v614_v41 = vclamps-f32 %v490_v29, 1.0 }
  0x77   :  { %615 = vst [vmem:[%s1042_s2 + $0x18] sm:$0xff] %v614_v41 }
  0x78   :  { %510 = vsyncpa [#allocation3], 1 }

</bundles_post_ra>
